<compile_context>
chip_gen: v7x
topology: tpu7x:2x2x1
jax: 0.10.0
libtpu: 0.0.40
codegen_flags: <defaults>
</compile_context>

<pallas_src>
import math
import functools

import jax
import jax.numpy as jnp
from jax.experimental import pallas as pl
from jax.experimental.pallas import tpu as pltpu


# ----------------------------- Pallas kernel -------------------------------

def _block_kernel(x_ref, gamma_ref, beta_ref, w1_ref, b1_ref,
                  w2a_ref, w2b_ref, b2_ref, cos_ref, sin_ref,
                  o_ref, *, C, H, D, Bt, L, approx_recip):
    R = Bt * L
    mmd = w1_ref.dtype                     # MXU operand dtype (f32 or bf16)

    x = x_ref[...]                         # (R, C) f32 rows (Bt merged batches)

    # --- LayerNorm (eps=1e-6, biased variance), f32 on the VPU ---
    mean = jnp.mean(x, axis=-1, keepdims=True)
    var = jnp.mean((x - mean) ** 2, axis=-1, keepdims=True)
    xn = (x - mean) * jax.lax.rsqrt(var + 1e-6)
    xn = xn * gamma_ref[...] + beta_ref[...]

    # --- linear1: [q, k, v, q_rot, k_rot] columns.  The unused `mlp` split was
    # dropped host-side; 1/sqrt(D) and the signed rotate-half permutation are
    # folded into the weights, so no per-step lane rolls are needed for RoPE.
    h = (jnp.dot(xn.astype(mmd), w1_ref[...],
                 preferred_element_type=jnp.float32) + b1_ref[...])   # (R, 5C)

    q = h[:, 0 * C:1 * C].reshape(Bt, L, C)
    k = h[:, 1 * C:2 * C].reshape(Bt, L, C)
    v = h[:, 2 * C:3 * C].reshape(Bt, L, C)
    q_rot = h[:, 3 * C:4 * C].reshape(Bt, L, C)
    k_rot = h[:, 4 * C:5 * C].reshape(Bt, L, C)

    # --- RoPE: (L, C) tables broadcast over the Bt merged batches ---
    cos = cos_ref[...]
    sin = sin_ref[...]
    q = q * cos + q_rot * sin
    k = k * cos + k_rot * sin

    # --- attention with linear2 fused into the per-head loop: each head's
    # output feeds its (D, C) slice of w2 (attn part + gelu part) and is
    # accumulated into y (no attn scratch slab, no masked stores, no concat).
    y = x + b2_ref[...]                    # residual + linear2 bias (f32 acc)
    for hd in range(H):
        sl = slice(hd * D, (hd + 1) * D)
        qh = q[:, :, sl].astype(mmd)       # (Bt, L, D)
        kh = k[:, :, sl].astype(mmd)
        vh = v[:, :, sl].astype(mmd)
        s = jnp.einsum('bld,bmd->blm', qh, kh,
                       preferred_element_type=jnp.float32)        # (Bt, L, L)
        s = s - jnp.max(s, axis=-1, keepdims=True)
        p = jnp.exp(s)
        p = p * pl.reciprocal(jnp.sum(p, axis=-1, keepdims=True),
                              approx=approx_recip)
        oh = jnp.einsum('blm,bmd->bld', p.astype(mmd), vh,
                        preferred_element_type=jnp.float32)       # (Bt, L, D)
        oh = oh.reshape(R, D)
        gh = jax.nn.gelu(oh, approximate=True)                    # f32 VPU/EUP
        y = y + jnp.dot(oh.astype(mmd), w2a_ref[hd],
                        preferred_element_type=jnp.float32)
        y = y + jnp.dot(gh.astype(mmd), w2b_ref[hd],
                        preferred_element_type=jnp.float32)

    o_ref[...] = y.astype(o_ref.dtype)


# ------------------------------ host wrapper --------------------------------

def transformer_parallel_block(x, params, *, num_heads, rows_target=256,
                               compute_dtype=jnp.float32):
    B, L, C = x.shape
    H = num_heads
    D = C // H
    gamma, beta, w1, b1, w2, b2, cos, sin = params
    scale = 1.0 / math.sqrt(D)

    # --- host-side weight folding (zero kernel cost) ---
    wq, wk, wv = w1[:, :C] * scale, w1[:, C:2 * C], w1[:, 2 * C:3 * C]
    bq, bk, bv = b1[:, :C] * scale, b1[:, C:2 * C], b1[:, 2 * C:3 * C]

    def rot_cols(a):                       # signed per-head rotate-half (cols)
        ah = a.reshape(a.shape[:-1] + (H, D))
        a1, a2 = ah[..., :D // 2], ah[..., D // 2:]
        return jnp.concatenate([-a2, a1], axis=-1).reshape(a.shape)

    w1_all = jnp.concatenate([wq, wk, wv, rot_cols(wq), rot_cols(wk)], axis=1)
    b1_all = jnp.concatenate([bq, bk, bv, rot_cols(bq), rot_cols(bk)], axis=1)

    # split linear2, laid out (H, D, C) so the kernel indexes whole head blocks.
    w2a = w2[:C, :].reshape(H, D, C)       # multiplies attn
    w2b = w2[C:, :].reshape(H, D, C)       # multiplies gelu(attn)

    # per-head-tiled (L, C) RoPE tables (broadcast over Bt inside the kernel).
    cos_slab = jnp.tile(cos, (1, H))
    sin_slab = jnp.tile(sin, (1, H))

    # MXU operand dtype; biases / norm params / tables stay f32.
    w1_all = w1_all.astype(compute_dtype)
    w2a = w2a.astype(compute_dtype)
    w2b = w2b.astype(compute_dtype)

    # merge whole batches into the row dim for bigger MXU M, but keep >= 2 grid
    # steps so v7x's two TensorCores and the DMA pipeline have work to overlap.
    max_bt = B if B < 2 else B // 2
    Bt = 1
    for cand in range(max_bt, 0, -1):
        if B % cand == 0 and cand * L <= max(L, rows_target):
            Bt = cand
            break
    R = Bt * L
    grid = (B // Bt,)

    x_rows = x.reshape(B * L, C)

    kernel = functools.partial(
        _block_kernel, C=C, H=H, D=D, Bt=Bt, L=L,
        approx_recip=(jnp.dtype(compute_dtype) == jnp.dtype(jnp.bfloat16)))

    def full(shape):
        zero = (0,) * len(shape)
        return pl.BlockSpec(shape, lambda i, _z=zero: _z)

    out_rows = pl.pallas_call(
        kernel,
        out_shape=jax.ShapeDtypeStruct((B * L, C), x.dtype),
        grid_spec=pltpu.PrefetchScalarGridSpec(
            num_scalar_prefetch=0,
            grid=grid,
            in_specs=[
                pl.BlockSpec((R, C), lambda i: (i, 0)),          # x rows
                full((1, C)), full((1, C)),                      # gamma, beta
                full((C, 5 * C)), full((1, 5 * C)),              # w1_all, b1_all
                full((H, D, C)), full((H, D, C)), full((1, C)),  # w2a, w2b, b2
                full((L, C)), full((L, C)),                      # cos, sin
            ],
            out_specs=pl.BlockSpec((R, C), lambda i: (i, 0)),
        ),
        compiler_params=pltpu.CompilerParams(
            dimension_semantics=("parallel",),
            vmem_limit_bytes=48 * 1024 * 1024),
    )(x_rows, gamma, beta, w1_all, b1_all, w2a, w2b, b2, cos_slab, sin_slab)

    return out_rows.reshape(B, L, C)


# --------------------------- pure-JAX reference -----------------------------

def reference(x, params, *, num_heads):
    B, L, C = x.shape
    D = C // num_heads
    gamma, beta, w1, b1, w2, b2, cos, sin = params

    mean = jnp.mean(x, axis=-1, keepdims=True)
    var = jnp.mean((x - mean) ** 2, axis=-1, keepdims=True)
    xn = (x - mean) / jnp.sqrt(var + 1e-6) * gamma[0] + beta[0]

    h = xn @ w1 + b1[0]
    qkv = h[..., : 3 * C]
    qkv = qkv.reshape(B, L, 3, num_heads, D).transpose(2, 0, 3, 1, 4)  # K B H L D
    q, k, v = qkv[0], qkv[1], qkv[2]

    def rope(t):
        t1 = t[..., : D // 2]
        t2 = t[..., D // 2:]
        rot = jnp.concatenate([-t2, t1], axis=-1)
        return t * cos + rot * sin

    q = rope(q)
    k = rope(k)

    s = jnp.einsum("bhqd,bhkd->bhqk", q, k) / math.sqrt(D)
    p = jax.nn.softmax(s, axis=-1)
    o = jnp.einsum("bhqk,bhkd->bhqd", p, v)
    attn = o.transpose(0, 2, 1, 3).reshape(B, L, C)

    mlp = jax.nn.gelu(attn, approximate=True)
    cat = jnp.concatenate([attn, mlp], axis=-1)
    y = cat @ w2 + b2[0]
    return x + y


# --------------------------------- main -------------------------------------

if __name__ == "__main__":
    # Small, shape-consistent config: in_channels=32, num_heads=4, mlp_ratio=1.0
    B, L, C = 2, 16, 32
    num_heads = 4
    D = C // num_heads
    mlp_ratio = 1.0
    mlp_hidden = int(C * mlp_ratio)
    out_dim1 = C * 3 + mlp_hidden        # linear1 out features
    in_dim2 = C + mlp_hidden             # linear2 in features (== 2C here)

    key = jax.random.PRNGKey(0)
    k_x, k_w1, k_b1, k_w2, k_b2, k_g, k_bt = jax.random.split(key, 7)

    x = jax.random.normal(k_x, (B, L, C), dtype=jnp.float32)

    gamma = 1.0 + 0.1 * jax.random.normal(k_g, (1, C), dtype=jnp.float32)
    beta = 0.1 * jax.random.normal(k_bt, (1, C), dtype=jnp.float32)
    w1 = jax.random.normal(k_w1, (C, out_dim1), dtype=jnp.float32) / math.sqrt(C)
    b1 = 0.1 * jax.random.normal(k_b1, (1, out_dim1), dtype=jnp.float32)
    w2 = jax.random.normal(k_w2, (in_dim2, C), dtype=jnp.float32) / math.sqrt(in_dim2)
    b2 = 0.1 * jax.random.normal(k_b2, (1, C), dtype=jnp.float32)

    # RoPE tables (theta = 10000), rotate-half convention.
    pos = jnp.arange(L, dtype=jnp.float32)[:, None]                  # (L, 1)
    inv_freq = 1.0 / (10000.0 ** (jnp.arange(0, D // 2, dtype=jnp.float32) * 2.0 / D))
    ang = pos * inv_freq[None, :]                                    # (L, D/2)
    cos = jnp.concatenate([jnp.cos(ang), jnp.cos(ang)], axis=-1)     # (L, D)
    sin = jnp.concatenate([jnp.sin(ang), jnp.sin(ang)], axis=-1)     # (L, D)

    params = (gamma, beta, w1, b1, w2, b2, cos, sin)

    ref = reference(x, params, num_heads=num_heads)

    # f32 parity run (strict 1e-4 check).
    out = transformer_parallel_block(x, params, num_heads=num_heads,
                                     compute_dtype=jnp.float32)
    out = jax.block_until_ready(out)
    assert out.shape == (B, L, C)
    assert jnp.allclose(out, ref, atol=1e-4, rtol=1e-4), "f32 mismatch vs reference"

    # bf16-operand run (production dtype plan for v6e/v7x): matched-precision
    # (loose) check only -- bf16 MXU operands cannot meet the 1e-4 bar.
    out_bf16 = transformer_parallel_block(x, params, num_heads=num_heads,
                                          compute_dtype=jnp.bfloat16)
    out_bf16 = jax.block_until_ready(out_bf16)
    assert out_bf16.shape == (B, L, C)
    assert bool(jnp.all(jnp.isfinite(out_bf16))), "bf16 path produced non-finite values"
    assert float(jnp.mean(jnp.abs(out_bf16 - ref))) < 0.1, "bf16 path far from reference"

    print("KERNEL_OK")
</pallas_src>

<mosaic_0001>
module attributes {stable_mosaic.version = 11 : i64} {
  func.func @_block_kernel(%arg0: i32, %arg1: memref<16x32xf32, #tpu.memory_space<vmem>>, %arg2: memref<1x32xf32, #tpu.memory_space<vmem>>, %arg3: memref<1x32xf32, #tpu.memory_space<vmem>>, %arg4: memref<32x160xf32, #tpu.memory_space<vmem>>, %arg5: memref<1x160xf32, #tpu.memory_space<vmem>>, %arg6: memref<4x8x32xf32, #tpu.memory_space<vmem>>, %arg7: memref<4x8x32xf32, #tpu.memory_space<vmem>>, %arg8: memref<1x32xf32, #tpu.memory_space<vmem>>, %arg9: memref<16x32xf32, #tpu.memory_space<vmem>>, %arg10: memref<16x32xf32, #tpu.memory_space<vmem>>, %arg11: memref<16x32xf32, #tpu.memory_space<vmem>>) attributes {dimension_semantics = [#tpu.dimension_semantics<parallel>], iteration_bounds = array<i64: 2>, scalar_prefetch = 0 : i64, scratch_operands = 0 : i64, tpu.core_type = #tpu.core_type<tc>, window_params = [{transform_indices = @transform_0, window_bounds = array<i64: 16, 32>}, {pipeline_mode = #tpu.pipeline_mode<synchronous>, transform_indices = @transform_1, window_bounds = array<i64: 1, 32>}, {pipeline_mode = #tpu.pipeline_mode<synchronous>, transform_indices = @transform_2, window_bounds = array<i64: 1, 32>}, {pipeline_mode = #tpu.pipeline_mode<synchronous>, transform_indices = @transform_3, window_bounds = array<i64: 32, 160>}, {pipeline_mode = #tpu.pipeline_mode<synchronous>, transform_indices = @transform_4, window_bounds = array<i64: 1, 160>}, {pipeline_mode = #tpu.pipeline_mode<synchronous>, transform_indices = @transform_5, window_bounds = array<i64: 4, 8, 32>}, {pipeline_mode = #tpu.pipeline_mode<synchronous>, transform_indices = @transform_6, window_bounds = array<i64: 4, 8, 32>}, {pipeline_mode = #tpu.pipeline_mode<synchronous>, transform_indices = @transform_7, window_bounds = array<i64: 1, 32>}, {pipeline_mode = #tpu.pipeline_mode<synchronous>, transform_indices = @transform_8, window_bounds = array<i64: 16, 32>}, {pipeline_mode = #tpu.pipeline_mode<synchronous>, transform_indices = @transform_9, window_bounds = array<i64: 16, 32>}, {transform_indices = @transform_10, window_bounds = array<i64: 16, 32>}]} {
    %c0 = arith.constant 0 : index
    %c0_0 = arith.constant 0 : index
    %0 = vector.load %arg1[%c0, %c0_0] : memref<16x32xf32, #tpu.memory_space<vmem>>, vector<16x32xf32>
    %cst = arith.constant dense<0.000000e+00> : vector<16xf32>
    %1 = vector.multi_reduction <add>, %0, %cst [1] : vector<16x32xf32> to vector<16xf32>
    %2 = vector.shape_cast %1 : vector<16xf32> to vector<16x1xf32>
    %cst_1 = arith.constant 3.200000e+01 : f32
    %3 = vector.broadcast %cst_1 : f32 to vector<16x1xf32>
    %4 = arith.divf %2, %3 : vector<16x1xf32>
    %5 = vector.broadcast %4 : vector<16x1xf32> to vector<16x32xf32>
    %6 = arith.subf %0, %5 : vector<16x32xf32>
    %7 = arith.mulf %6, %6 : vector<16x32xf32>
    %cst_2 = arith.constant dense<0.000000e+00> : vector<16xf32>
    %8 = vector.multi_reduction <add>, %7, %cst_2 [1] : vector<16x32xf32> to vector<16xf32>
    %9 = vector.shape_cast %8 : vector<16xf32> to vector<16x1xf32>
    %cst_3 = arith.constant 3.200000e+01 : f32
    %10 = vector.broadcast %cst_3 : f32 to vector<16x1xf32>
    %11 = arith.divf %9, %10 : vector<16x1xf32>
    %12 = vector.broadcast %4 : vector<16x1xf32> to vector<16x32xf32>
    %13 = arith.subf %0, %12 : vector<16x32xf32>
    %cst_4 = arith.constant 9.99999997E-7 : f32
    %14 = vector.broadcast %cst_4 : f32 to vector<16x1xf32>
    %15 = arith.addf %11, %14 : vector<16x1xf32>
    %16 = math.rsqrt %15 : vector<16x1xf32>
    %17 = vector.broadcast %16 : vector<16x1xf32> to vector<16x32xf32>
    %18 = arith.mulf %13, %17 : vector<16x32xf32>
    %c0_5 = arith.constant 0 : index
    %c0_6 = arith.constant 0 : index
    %19 = vector.load %arg2[%c0_5, %c0_6] : memref<1x32xf32, #tpu.memory_space<vmem>>, vector<1x32xf32>
    %20 = vector.broadcast %19 : vector<1x32xf32> to vector<16x32xf32>
    %21 = arith.mulf %18, %20 : vector<16x32xf32>
    %c0_7 = arith.constant 0 : index
    %c0_8 = arith.constant 0 : index
    %22 = vector.load %arg3[%c0_7, %c0_8] : memref<1x32xf32, #tpu.memory_space<vmem>>, vector<1x32xf32>
    %23 = vector.broadcast %22 : vector<1x32xf32> to vector<16x32xf32>
    %24 = arith.addf %21, %23 : vector<16x32xf32>
    %c0_9 = arith.constant 0 : index
    %c0_10 = arith.constant 0 : index
    %25 = vector.load %arg4[%c0_9, %c0_10] : memref<32x160xf32, #tpu.memory_space<vmem>>, vector<32x160xf32>
    %cst_11 = arith.constant dense<0.000000e+00> : vector<16x160xf32>
    %26 = tpu.matmul %24, %25, %cst_11 {dimension_numbers = #tpu.dot_dimension_numbers<[1], [0], [0], [1], [0, 0, 1, 1], [], []>} : vector<16x32xf32>, vector<32x160xf32>, vector<16x160xf32> -> vector<16x160xf32>
    %c0_12 = arith.constant 0 : index
    %c0_13 = arith.constant 0 : index
    %27 = vector.load %arg5[%c0_12, %c0_13] : memref<1x160xf32, #tpu.memory_space<vmem>>, vector<1x160xf32>
    %28 = vector.broadcast %27 : vector<1x160xf32> to vector<16x160xf32>
    %29 = arith.addf %26, %28 : vector<16x160xf32>
    %30 = vector.extract_strided_slice %29 {offsets = [0, 0], sizes = [16, 32], strides = [1, 1]} : vector<16x160xf32> to vector<16x32xf32>
    %31 = vector.shape_cast %30 : vector<16x32xf32> to vector<1x16x32xf32>
    %32 = vector.extract_strided_slice %29 {offsets = [0, 32], sizes = [16, 32], strides = [1, 1]} : vector<16x160xf32> to vector<16x32xf32>
    %33 = vector.shape_cast %32 : vector<16x32xf32> to vector<1x16x32xf32>
    %34 = vector.extract_strided_slice %29 {offsets = [0, 64], sizes = [16, 32], strides = [1, 1]} : vector<16x160xf32> to vector<16x32xf32>
    %35 = vector.shape_cast %34 : vector<16x32xf32> to vector<1x16x32xf32>
    %36 = vector.extract_strided_slice %29 {offsets = [0, 96], sizes = [16, 32], strides = [1, 1]} : vector<16x160xf32> to vector<16x32xf32>
    %37 = vector.shape_cast %36 : vector<16x32xf32> to vector<1x16x32xf32>
    %38 = vector.extract_strided_slice %29 {offsets = [0, 128], sizes = [16, 32], strides = [1, 1]} : vector<16x160xf32> to vector<16x32xf32>
    %39 = vector.shape_cast %38 : vector<16x32xf32> to vector<1x16x32xf32>
    %c0_14 = arith.constant 0 : index
    %c0_15 = arith.constant 0 : index
    %40 = vector.load %arg9[%c0_14, %c0_15] : memref<16x32xf32, #tpu.memory_space<vmem>>, vector<16x32xf32>
    %c0_16 = arith.constant 0 : index
    %c0_17 = arith.constant 0 : index
    %41 = vector.load %arg10[%c0_16, %c0_17] : memref<16x32xf32, #tpu.memory_space<vmem>>, vector<16x32xf32>
    %42 = vector.shape_cast %40 : vector<16x32xf32> to vector<1x16x32xf32>
    %43 = arith.mulf %31, %42 : vector<1x16x32xf32>
    %44 = vector.shape_cast %41 : vector<16x32xf32> to vector<1x16x32xf32>
    %45 = arith.mulf %37, %44 : vector<1x16x32xf32>
    %46 = arith.addf %43, %45 : vector<1x16x32xf32>
    %47 = vector.shape_cast %40 : vector<16x32xf32> to vector<1x16x32xf32>
    %48 = arith.mulf %33, %47 : vector<1x16x32xf32>
    %49 = vector.shape_cast %41 : vector<16x32xf32> to vector<1x16x32xf32>
    %50 = arith.mulf %39, %49 : vector<1x16x32xf32>
    %51 = arith.addf %48, %50 : vector<1x16x32xf32>
    %c0_18 = arith.constant 0 : index
    %c0_19 = arith.constant 0 : index
    %52 = vector.load %arg8[%c0_18, %c0_19] : memref<1x32xf32, #tpu.memory_space<vmem>>, vector<1x32xf32>
    %53 = vector.broadcast %52 : vector<1x32xf32> to vector<16x32xf32>
    %54 = arith.addf %0, %53 : vector<16x32xf32>
    %55 = vector.extract_strided_slice %46 {offsets = [0, 0, 0], sizes = [1, 16, 8], strides = [1, 1, 1]} : vector<1x16x32xf32> to vector<1x16x8xf32>
    %56 = vector.extract_strided_slice %51 {offsets = [0, 0, 0], sizes = [1, 16, 8], strides = [1, 1, 1]} : vector<1x16x32xf32> to vector<1x16x8xf32>
    %57 = vector.extract_strided_slice %35 {offsets = [0, 0, 0], sizes = [1, 16, 8], strides = [1, 1, 1]} : vector<1x16x32xf32> to vector<1x16x8xf32>
    "tpu.trace_start"() <{level = 10 : i32, message = "bld,bmd->blm"}> : () -> ()
    %cst_20 = arith.constant dense<0.000000e+00> : vector<1x16x16xf32>
    %58 = tpu.matmul %55, %56, %cst_20 {dimension_numbers = #tpu.dot_dimension_numbers<[2], [2], [1], [1], [0, 0, 0, 1, 1, 1], [0], [0]>} : vector<1x16x8xf32>, vector<1x16x8xf32>, vector<1x16x16xf32> -> vector<1x16x16xf32>
    "tpu.trace_stop"() : () -> ()
    %cst_21 = arith.constant dense<0xFF800000> : vector<1x16xf32>
    %59 = vector.multi_reduction <maximumf>, %58, %cst_21 [2] : vector<1x16x16xf32> to vector<1x16xf32>
    %60 = vector.shape_cast %59 : vector<1x16xf32> to vector<1x16x1xf32>
    %61 = vector.broadcast %60 : vector<1x16x1xf32> to vector<1x16x16xf32>
    %62 = arith.subf %58, %61 : vector<1x16x16xf32>
    %63 = math.exp %62 : vector<1x16x16xf32>
    %cst_22 = arith.constant dense<0.000000e+00> : vector<1x16xf32>
    %64 = vector.multi_reduction <add>, %63, %cst_22 [2] : vector<1x16x16xf32> to vector<1x16xf32>
    %65 = vector.shape_cast %64 : vector<1x16xf32> to vector<1x16x1xf32>
    %66 = tpu.reciprocal %65 : vector<1x16x1xf32> -> vector<1x16x1xf32>
    %67 = vector.broadcast %66 : vector<1x16x1xf32> to vector<1x16x16xf32>
    %68 = arith.mulf %63, %67 : vector<1x16x16xf32>
    "tpu.trace_start"() <{level = 10 : i32, message = "blm,bmd->bld"}> : () -> ()
    %cst_23 = arith.constant dense<0.000000e+00> : vector<1x16x8xf32>
    %69 = tpu.matmul %68, %57, %cst_23 {dimension_numbers = #tpu.dot_dimension_numbers<[2], [1], [1], [2], [0, 0, 0, 1, 1, 2], [0], [0]>} : vector<1x16x16xf32>, vector<1x16x8xf32>, vector<1x16x8xf32> -> vector<1x16x8xf32>
    "tpu.trace_stop"() : () -> ()
    %70 = vector.shape_cast %69 : vector<1x16x8xf32> to vector<16x8xf32>
    %71 = arith.mulf %70, %70 : vector<16x8xf32>
    %72 = arith.mulf %70, %71 : vector<16x8xf32>
    %cst_24 = arith.constant 4.471500e-02 : f32
    %73 = vector.broadcast %cst_24 : f32 to vector<16x8xf32>
    %74 = arith.mulf %73, %72 : vector<16x8xf32>
    %75 = arith.addf %70, %74 : vector<16x8xf32>
    %cst_25 = arith.constant 0.797884583 : f32
    %76 = vector.broadcast %cst_25 : f32 to vector<16x8xf32>
    %77 = arith.mulf %76, %75 : vector<16x8xf32>
    %78 = math.tanh %77 : vector<16x8xf32>
    %cst_26 = arith.constant 1.000000e+00 : f32
    %79 = vector.broadcast %cst_26 : f32 to vector<16x8xf32>
    %80 = arith.addf %79, %78 : vector<16x8xf32>
    %cst_27 = arith.constant 5.000000e-01 : f32
    %81 = vector.broadcast %cst_27 : f32 to vector<16x8xf32>
    %82 = arith.mulf %81, %80 : vector<16x8xf32>
    %83 = arith.mulf %70, %82 : vector<16x8xf32>
    %c0_28 = arith.constant 0 : index
    %c0_29 = arith.constant 0 : index
    %c0_30 = arith.constant 0 : index
    %84 = vector.load %arg6[%c0_28, %c0_29, %c0_30] : memref<4x8x32xf32, #tpu.memory_space<vmem>>, vector<1x8x32xf32>
    %85 = vector.shape_cast %84 : vector<1x8x32xf32> to vector<8x32xf32>
    %cst_31 = arith.constant dense<0.000000e+00> : vector<16x32xf32>
    %86 = tpu.matmul %70, %85, %cst_31 {dimension_numbers = #tpu.dot_dimension_numbers<[1], [0], [0], [1], [0, 0, 1, 1], [], []>} : vector<16x8xf32>, vector<8x32xf32>, vector<16x32xf32> -> vector<16x32xf32>
    %87 = arith.addf %54, %86 : vector<16x32xf32>
    %c0_32 = arith.constant 0 : index
    %c0_33 = arith.constant 0 : index
    %c0_34 = arith.constant 0 : index
    %88 = vector.load %arg7[%c0_32, %c0_33, %c0_34] : memref<4x8x32xf32, #tpu.memory_space<vmem>>, vector<1x8x32xf32>
    %89 = vector.shape_cast %88 : vector<1x8x32xf32> to vector<8x32xf32>
    %cst_35 = arith.constant dense<0.000000e+00> : vector<16x32xf32>
    %90 = tpu.matmul %83, %89, %cst_35 {dimension_numbers = #tpu.dot_dimension_numbers<[1], [0], [0], [1], [0, 0, 1, 1], [], []>} : vector<16x8xf32>, vector<8x32xf32>, vector<16x32xf32> -> vector<16x32xf32>
    %91 = arith.addf %87, %90 : vector<16x32xf32>
    %92 = vector.extract_strided_slice %46 {offsets = [0, 0, 8], sizes = [1, 16, 8], strides = [1, 1, 1]} : vector<1x16x32xf32> to vector<1x16x8xf32>
    %93 = vector.extract_strided_slice %51 {offsets = [0, 0, 8], sizes = [1, 16, 8], strides = [1, 1, 1]} : vector<1x16x32xf32> to vector<1x16x8xf32>
    %94 = vector.extract_strided_slice %35 {offsets = [0, 0, 8], sizes = [1, 16, 8], strides = [1, 1, 1]} : vector<1x16x32xf32> to vector<1x16x8xf32>
    "tpu.trace_start"() <{level = 10 : i32, message = "bld,bmd->blm"}> : () -> ()
    %cst_36 = arith.constant dense<0.000000e+00> : vector<1x16x16xf32>
    %95 = tpu.matmul %92, %93, %cst_36 {dimension_numbers = #tpu.dot_dimension_numbers<[2], [2], [1], [1], [0, 0, 0, 1, 1, 1], [0], [0]>} : vector<1x16x8xf32>, vector<1x16x8xf32>, vector<1x16x16xf32> -> vector<1x16x16xf32>
    "tpu.trace_stop"() : () -> ()
    %cst_37 = arith.constant dense<0xFF800000> : vector<1x16xf32>
    %96 = vector.multi_reduction <maximumf>, %95, %cst_37 [2] : vector<1x16x16xf32> to vector<1x16xf32>
    %97 = vector.shape_cast %96 : vector<1x16xf32> to vector<1x16x1xf32>
    %98 = vector.broadcast %97 : vector<1x16x1xf32> to vector<1x16x16xf32>
    %99 = arith.subf %95, %98 : vector<1x16x16xf32>
    %100 = math.exp %99 : vector<1x16x16xf32>
    %cst_38 = arith.constant dense<0.000000e+00> : vector<1x16xf32>
    %101 = vector.multi_reduction <add>, %100, %cst_38 [2] : vector<1x16x16xf32> to vector<1x16xf32>
    %102 = vector.shape_cast %101 : vector<1x16xf32> to vector<1x16x1xf32>
    %103 = tpu.reciprocal %102 : vector<1x16x1xf32> -> vector<1x16x1xf32>
    %104 = vector.broadcast %103 : vector<1x16x1xf32> to vector<1x16x16xf32>
    %105 = arith.mulf %100, %104 : vector<1x16x16xf32>
    "tpu.trace_start"() <{level = 10 : i32, message = "blm,bmd->bld"}> : () -> ()
    %cst_39 = arith.constant dense<0.000000e+00> : vector<1x16x8xf32>
    %106 = tpu.matmul %105, %94, %cst_39 {dimension_numbers = #tpu.dot_dimension_numbers<[2], [1], [1], [2], [0, 0, 0, 1, 1, 2], [0], [0]>} : vector<1x16x16xf32>, vector<1x16x8xf32>, vector<1x16x8xf32> -> vector<1x16x8xf32>
    "tpu.trace_stop"() : () -> ()
    %107 = vector.shape_cast %106 : vector<1x16x8xf32> to vector<16x8xf32>
    %108 = arith.mulf %107, %107 : vector<16x8xf32>
    %109 = arith.mulf %107, %108 : vector<16x8xf32>
    %cst_40 = arith.constant 4.471500e-02 : f32
    %110 = vector.broadcast %cst_40 : f32 to vector<16x8xf32>
    %111 = arith.mulf %110, %109 : vector<16x8xf32>
    %112 = arith.addf %107, %111 : vector<16x8xf32>
    %cst_41 = arith.constant 0.797884583 : f32
    %113 = vector.broadcast %cst_41 : f32 to vector<16x8xf32>
    %114 = arith.mulf %113, %112 : vector<16x8xf32>
    %115 = math.tanh %114 : vector<16x8xf32>
    %cst_42 = arith.constant 1.000000e+00 : f32
    %116 = vector.broadcast %cst_42 : f32 to vector<16x8xf32>
    %117 = arith.addf %116, %115 : vector<16x8xf32>
    %cst_43 = arith.constant 5.000000e-01 : f32
    %118 = vector.broadcast %cst_43 : f32 to vector<16x8xf32>
    %119 = arith.mulf %118, %117 : vector<16x8xf32>
    %120 = arith.mulf %107, %119 : vector<16x8xf32>
    %c1 = arith.constant 1 : index
    %c0_44 = arith.constant 0 : index
    %c0_45 = arith.constant 0 : index
    %121 = vector.load %arg6[%c1, %c0_44, %c0_45] : memref<4x8x32xf32, #tpu.memory_space<vmem>>, vector<1x8x32xf32>
    %122 = vector.shape_cast %121 : vector<1x8x32xf32> to vector<8x32xf32>
    %cst_46 = arith.constant dense<0.000000e+00> : vector<16x32xf32>
    %123 = tpu.matmul %107, %122, %cst_46 {dimension_numbers = #tpu.dot_dimension_numbers<[1], [0], [0], [1], [0, 0, 1, 1], [], []>} : vector<16x8xf32>, vector<8x32xf32>, vector<16x32xf32> -> vector<16x32xf32>
    %124 = arith.addf %91, %123 : vector<16x32xf32>
    %c1_47 = arith.constant 1 : index
    %c0_48 = arith.constant 0 : index
    %c0_49 = arith.constant 0 : index
    %125 = vector.load %arg7[%c1_47, %c0_48, %c0_49] : memref<4x8x32xf32, #tpu.memory_space<vmem>>, vector<1x8x32xf32>
    %126 = vector.shape_cast %125 : vector<1x8x32xf32> to vector<8x32xf32>
    %cst_50 = arith.constant dense<0.000000e+00> : vector<16x32xf32>
    %127 = tpu.matmul %120, %126, %cst_50 {dimension_numbers = #tpu.dot_dimension_numbers<[1], [0], [0], [1], [0, 0, 1, 1], [], []>} : vector<16x8xf32>, vector<8x32xf32>, vector<16x32xf32> -> vector<16x32xf32>
    %128 = arith.addf %124, %127 : vector<16x32xf32>
    %129 = vector.extract_strided_slice %46 {offsets = [0, 0, 16], sizes = [1, 16, 8], strides = [1, 1, 1]} : vector<1x16x32xf32> to vector<1x16x8xf32>
    %130 = vector.extract_strided_slice %51 {offsets = [0, 0, 16], sizes = [1, 16, 8], strides = [1, 1, 1]} : vector<1x16x32xf32> to vector<1x16x8xf32>
    %131 = vector.extract_strided_slice %35 {offsets = [0, 0, 16], sizes = [1, 16, 8], strides = [1, 1, 1]} : vector<1x16x32xf32> to vector<1x16x8xf32>
    "tpu.trace_start"() <{level = 10 : i32, message = "bld,bmd->blm"}> : () -> ()
    %cst_51 = arith.constant dense<0.000000e+00> : vector<1x16x16xf32>
    %132 = tpu.matmul %129, %130, %cst_51 {dimension_numbers = #tpu.dot_dimension_numbers<[2], [2], [1], [1], [0, 0, 0, 1, 1, 1], [0], [0]>} : vector<1x16x8xf32>, vector<1x16x8xf32>, vector<1x16x16xf32> -> vector<1x16x16xf32>
    "tpu.trace_stop"() : () -> ()
    %cst_52 = arith.constant dense<0xFF800000> : vector<1x16xf32>
    %133 = vector.multi_reduction <maximumf>, %132, %cst_52 [2] : vector<1x16x16xf32> to vector<1x16xf32>
    %134 = vector.shape_cast %133 : vector<1x16xf32> to vector<1x16x1xf32>
    %135 = vector.broadcast %134 : vector<1x16x1xf32> to vector<1x16x16xf32>
    %136 = arith.subf %132, %135 : vector<1x16x16xf32>
    %137 = math.exp %136 : vector<1x16x16xf32>
    %cst_53 = arith.constant dense<0.000000e+00> : vector<1x16xf32>
    %138 = vector.multi_reduction <add>, %137, %cst_53 [2] : vector<1x16x16xf32> to vector<1x16xf32>
    %139 = vector.shape_cast %138 : vector<1x16xf32> to vector<1x16x1xf32>
    %140 = tpu.reciprocal %139 : vector<1x16x1xf32> -> vector<1x16x1xf32>
    %141 = vector.broadcast %140 : vector<1x16x1xf32> to vector<1x16x16xf32>
    %142 = arith.mulf %137, %141 : vector<1x16x16xf32>
    "tpu.trace_start"() <{level = 10 : i32, message = "blm,bmd->bld"}> : () -> ()
    %cst_54 = arith.constant dense<0.000000e+00> : vector<1x16x8xf32>
    %143 = tpu.matmul %142, %131, %cst_54 {dimension_numbers = #tpu.dot_dimension_numbers<[2], [1], [1], [2], [0, 0, 0, 1, 1, 2], [0], [0]>} : vector<1x16x16xf32>, vector<1x16x8xf32>, vector<1x16x8xf32> -> vector<1x16x8xf32>
    "tpu.trace_stop"() : () -> ()
    %144 = vector.shape_cast %143 : vector<1x16x8xf32> to vector<16x8xf32>
    %145 = arith.mulf %144, %144 : vector<16x8xf32>
    %146 = arith.mulf %144, %145 : vector<16x8xf32>
    %cst_55 = arith.constant 4.471500e-02 : f32
    %147 = vector.broadcast %cst_55 : f32 to vector<16x8xf32>
    %148 = arith.mulf %147, %146 : vector<16x8xf32>
    %149 = arith.addf %144, %148 : vector<16x8xf32>
    %cst_56 = arith.constant 0.797884583 : f32
    %150 = vector.broadcast %cst_56 : f32 to vector<16x8xf32>
    %151 = arith.mulf %150, %149 : vector<16x8xf32>
    %152 = math.tanh %151 : vector<16x8xf32>
    %cst_57 = arith.constant 1.000000e+00 : f32
    %153 = vector.broadcast %cst_57 : f32 to vector<16x8xf32>
    %154 = arith.addf %153, %152 : vector<16x8xf32>
    %cst_58 = arith.constant 5.000000e-01 : f32
    %155 = vector.broadcast %cst_58 : f32 to vector<16x8xf32>
    %156 = arith.mulf %155, %154 : vector<16x8xf32>
    %157 = arith.mulf %144, %156 : vector<16x8xf32>
    %c2 = arith.constant 2 : index
    %c0_59 = arith.constant 0 : index
    %c0_60 = arith.constant 0 : index
    %158 = vector.load %arg6[%c2, %c0_59, %c0_60] : memref<4x8x32xf32, #tpu.memory_space<vmem>>, vector<1x8x32xf32>
    %159 = vector.shape_cast %158 : vector<1x8x32xf32> to vector<8x32xf32>
    %cst_61 = arith.constant dense<0.000000e+00> : vector<16x32xf32>
    %160 = tpu.matmul %144, %159, %cst_61 {dimension_numbers = #tpu.dot_dimension_numbers<[1], [0], [0], [1], [0, 0, 1, 1], [], []>} : vector<16x8xf32>, vector<8x32xf32>, vector<16x32xf32> -> vector<16x32xf32>
    %161 = arith.addf %128, %160 : vector<16x32xf32>
    %c2_62 = arith.constant 2 : index
    %c0_63 = arith.constant 0 : index
    %c0_64 = arith.constant 0 : index
    %162 = vector.load %arg7[%c2_62, %c0_63, %c0_64] : memref<4x8x32xf32, #tpu.memory_space<vmem>>, vector<1x8x32xf32>
    %163 = vector.shape_cast %162 : vector<1x8x32xf32> to vector<8x32xf32>
    %cst_65 = arith.constant dense<0.000000e+00> : vector<16x32xf32>
    %164 = tpu.matmul %157, %163, %cst_65 {dimension_numbers = #tpu.dot_dimension_numbers<[1], [0], [0], [1], [0, 0, 1, 1], [], []>} : vector<16x8xf32>, vector<8x32xf32>, vector<16x32xf32> -> vector<16x32xf32>
    %165 = arith.addf %161, %164 : vector<16x32xf32>
    %166 = vector.extract_strided_slice %46 {offsets = [0, 0, 24], sizes = [1, 16, 8], strides = [1, 1, 1]} : vector<1x16x32xf32> to vector<1x16x8xf32>
    %167 = vector.extract_strided_slice %51 {offsets = [0, 0, 24], sizes = [1, 16, 8], strides = [1, 1, 1]} : vector<1x16x32xf32> to vector<1x16x8xf32>
    %168 = vector.extract_strided_slice %35 {offsets = [0, 0, 24], sizes = [1, 16, 8], strides = [1, 1, 1]} : vector<1x16x32xf32> to vector<1x16x8xf32>
    "tpu.trace_start"() <{level = 10 : i32, message = "bld,bmd->blm"}> : () -> ()
    %cst_66 = arith.constant dense<0.000000e+00> : vector<1x16x16xf32>
    %169 = tpu.matmul %166, %167, %cst_66 {dimension_numbers = #tpu.dot_dimension_numbers<[2], [2], [1], [1], [0, 0, 0, 1, 1, 1], [0], [0]>} : vector<1x16x8xf32>, vector<1x16x8xf32>, vector<1x16x16xf32> -> vector<1x16x16xf32>
    "tpu.trace_stop"() : () -> ()
    %cst_67 = arith.constant dense<0xFF800000> : vector<1x16xf32>
    %170 = vector.multi_reduction <maximumf>, %169, %cst_67 [2] : vector<1x16x16xf32> to vector<1x16xf32>
    %171 = vector.shape_cast %170 : vector<1x16xf32> to vector<1x16x1xf32>
    %172 = vector.broadcast %171 : vector<1x16x1xf32> to vector<1x16x16xf32>
    %173 = arith.subf %169, %172 : vector<1x16x16xf32>
    %174 = math.exp %173 : vector<1x16x16xf32>
    %cst_68 = arith.constant dense<0.000000e+00> : vector<1x16xf32>
    %175 = vector.multi_reduction <add>, %174, %cst_68 [2] : vector<1x16x16xf32> to vector<1x16xf32>
    %176 = vector.shape_cast %175 : vector<1x16xf32> to vector<1x16x1xf32>
    %177 = tpu.reciprocal %176 : vector<1x16x1xf32> -> vector<1x16x1xf32>
    %178 = vector.broadcast %177 : vector<1x16x1xf32> to vector<1x16x16xf32>
    %179 = arith.mulf %174, %178 : vector<1x16x16xf32>
    "tpu.trace_start"() <{level = 10 : i32, message = "blm,bmd->bld"}> : () -> ()
    %cst_69 = arith.constant dense<0.000000e+00> : vector<1x16x8xf32>
    %180 = tpu.matmul %179, %168, %cst_69 {dimension_numbers = #tpu.dot_dimension_numbers<[2], [1], [1], [2], [0, 0, 0, 1, 1, 2], [0], [0]>} : vector<1x16x16xf32>, vector<1x16x8xf32>, vector<1x16x8xf32> -> vector<1x16x8xf32>
    "tpu.trace_stop"() : () -> ()
    %181 = vector.shape_cast %180 : vector<1x16x8xf32> to vector<16x8xf32>
    %182 = arith.mulf %181, %181 : vector<16x8xf32>
    %183 = arith.mulf %181, %182 : vector<16x8xf32>
    %cst_70 = arith.constant 4.471500e-02 : f32
    %184 = vector.broadcast %cst_70 : f32 to vector<16x8xf32>
    %185 = arith.mulf %184, %183 : vector<16x8xf32>
    %186 = arith.addf %181, %185 : vector<16x8xf32>
    %cst_71 = arith.constant 0.797884583 : f32
    %187 = vector.broadcast %cst_71 : f32 to vector<16x8xf32>
    %188 = arith.mulf %187, %186 : vector<16x8xf32>
    %189 = math.tanh %188 : vector<16x8xf32>
    %cst_72 = arith.constant 1.000000e+00 : f32
    %190 = vector.broadcast %cst_72 : f32 to vector<16x8xf32>
    %191 = arith.addf %190, %189 : vector<16x8xf32>
    %cst_73 = arith.constant 5.000000e-01 : f32
    %192 = vector.broadcast %cst_73 : f32 to vector<16x8xf32>
    %193 = arith.mulf %192, %191 : vector<16x8xf32>
    %194 = arith.mulf %181, %193 : vector<16x8xf32>
    %c3 = arith.constant 3 : index
    %c0_74 = arith.constant 0 : index
    %c0_75 = arith.constant 0 : index
    %195 = vector.load %arg6[%c3, %c0_74, %c0_75] : memref<4x8x32xf32, #tpu.memory_space<vmem>>, vector<1x8x32xf32>
    %196 = vector.shape_cast %195 : vector<1x8x32xf32> to vector<8x32xf32>
    %cst_76 = arith.constant dense<0.000000e+00> : vector<16x32xf32>
    %197 = tpu.matmul %181, %196, %cst_76 {dimension_numbers = #tpu.dot_dimension_numbers<[1], [0], [0], [1], [0, 0, 1, 1], [], []>} : vector<16x8xf32>, vector<8x32xf32>, vector<16x32xf32> -> vector<16x32xf32>
    %198 = arith.addf %165, %197 : vector<16x32xf32>
    %c3_77 = arith.constant 3 : index
    %c0_78 = arith.constant 0 : index
    %c0_79 = arith.constant 0 : index
    %199 = vector.load %arg7[%c3_77, %c0_78, %c0_79] : memref<4x8x32xf32, #tpu.memory_space<vmem>>, vector<1x8x32xf32>
    %200 = vector.shape_cast %199 : vector<1x8x32xf32> to vector<8x32xf32>
    %cst_80 = arith.constant dense<0.000000e+00> : vector<16x32xf32>
    %201 = tpu.matmul %194, %200, %cst_80 {dimension_numbers = #tpu.dot_dimension_numbers<[1], [0], [0], [1], [0, 0, 1, 1], [], []>} : vector<16x8xf32>, vector<8x32xf32>, vector<16x32xf32> -> vector<16x32xf32>
    %202 = arith.addf %198, %201 : vector<16x32xf32>
    %c0_81 = arith.constant 0 : index
    %c0_82 = arith.constant 0 : index
    %203 = vector.load %arg11[%c0_81, %c0_82] : memref<16x32xf32, #tpu.memory_space<vmem>>, vector<16x32xf32>
    tpu.vector_store %arg11[%c0_81, %c0_82], %202 {strides = array<i32>} : memref<16x32xf32, #tpu.memory_space<vmem>>, vector<16x32xf32>,
    return
  }
  func.func @transform_0(%arg0: i32) -> (i32, i32) {
    %c0_i32 = arith.constant 0 : i32
    %c0_i32_0 = arith.constant 0 : i32
    return %arg0, %c0_i32 : i32, i32
  }
  func.func @transform_1(%arg0: i32) -> (i32, i32) {
    %c0_i32 = arith.constant 0 : i32
    %c0_i32_0 = arith.constant 0 : i32
    %c0_i32_1 = arith.constant 0 : i32
    return %c0_i32, %c0_i32_0 : i32, i32
  }
  func.func @transform_2(%arg0: i32) -> (i32, i32) {
    %c0_i32 = arith.constant 0 : i32
    %c0_i32_0 = arith.constant 0 : i32
    %c0_i32_1 = arith.constant 0 : i32
    return %c0_i32, %c0_i32_0 : i32, i32
  }
  func.func @transform_3(%arg0: i32) -> (i32, i32) {
    %c0_i32 = arith.constant 0 : i32
    %c0_i32_0 = arith.constant 0 : i32
    %c0_i32_1 = arith.constant 0 : i32
    return %c0_i32, %c0_i32_0 : i32, i32
  }
  func.func @transform_4(%arg0: i32) -> (i32, i32) {
    %c0_i32 = arith.constant 0 : i32
    %c0_i32_0 = arith.constant 0 : i32
    %c0_i32_1 = arith.constant 0 : i32
    return %c0_i32, %c0_i32_0 : i32, i32
  }
  func.func @transform_5(%arg0: i32) -> (i32, i32, i32) {
    %c0_i32 = arith.constant 0 : i32
    %c0_i32_0 = arith.constant 0 : i32
    %c0_i32_1 = arith.constant 0 : i32
    %c0_i32_2 = arith.constant 0 : i32
    return %c0_i32, %c0_i32_0, %c0_i32_1 : i32, i32, i32
  }
  func.func @transform_6(%arg0: i32) -> (i32, i32, i32) {
    %c0_i32 = arith.constant 0 : i32
    %c0_i32_0 = arith.constant 0 : i32
    %c0_i32_1 = arith.constant 0 : i32
    %c0_i32_2 = arith.constant 0 : i32
    return %c0_i32, %c0_i32_0, %c0_i32_1 : i32, i32, i32
  }
  func.func @transform_7(%arg0: i32) -> (i32, i32) {
    %c0_i32 = arith.constant 0 : i32
    %c0_i32_0 = arith.constant 0 : i32
    %c0_i32_1 = arith.constant 0 : i32
    return %c0_i32, %c0_i32_0 : i32, i32
  }
  func.func @transform_8(%arg0: i32) -> (i32, i32) {
    %c0_i32 = arith.constant 0 : i32
    %c0_i32_0 = arith.constant 0 : i32
    %c0_i32_1 = arith.constant 0 : i32
    return %c0_i32, %c0_i32_0 : i32, i32
  }
  func.func @transform_9(%arg0: i32) -> (i32, i32) {
    %c0_i32 = arith.constant 0 : i32
    %c0_i32_0 = arith.constant 0 : i32
    %c0_i32_1 = arith.constant 0 : i32
    return %c0_i32, %c0_i32_0 : i32, i32
  }
  func.func @transform_10(%arg0: i32) -> (i32, i32) {
    %c0_i32 = arith.constant 0 : i32
    %c0_i32_0 = arith.constant 0 : i32
    return %arg0, %c0_i32 : i32, i32
  }
}

</mosaic_0001>

<bundles_post_ra>
// kernel: tpu_custom_call.1
= control target key start
LH: loop header
LB: loop body
LE: loop exit
PB: predicated region body
PF: predicated region fallthrough
CT: control target
= control target key end

     0   :  { %s3739_s0 = inlined_call_operand.hbm [shape: f32[32,32], index: 0, kind: input, shape index: {}]   ;;  %s3740_s1 = inlined_call_operand.hbm [shape: f32[1,32], index: 1, kind: input, shape index: {}]   ;;  %s3741_s2 = inlined_call_operand.hbm [shape: f32[1,32], index: 2, kind: input, shape index: {}]   ;;  %s3742_s3 = inlined_call_operand.hbm [shape: f32[32,160], index: 3, kind: input, shape index: {}]   ;;  %s3743_s4 = inlined_call_operand.vmem [shape: f32[1,160], index: 4, kind: input, shape index: {}]   ;;  %s3744_s5 = inlined_call_operand.hbm [shape: f32[4,8,32], index: 5, kind: input, shape index: {}]   ;;  %s3745_s6 = inlined_call_operand.hbm [shape: f32[4,8,32], index: 6, kind: input, shape index: {}]   ;;  %s3746_s7 = inlined_call_operand.hbm [shape: f32[1,32], index: 7, kind: input, shape index: {}]   ;;  %s3747_s8 = inlined_call_operand.vmem [shape: f32[16,32], index: 8, kind: input, shape index: {}]   ;;  %s3748_s9 = inlined_call_operand.vmem [shape: f32[16,32], index: 9, kind: input, shape index: {}]   ;;  %s3749_s10 = inlined_call_operand.hbm [shape: f32[32,32], index: 10, kind: output, shape index: {}]  }
   0x1   :  { %3754 = sst [smem:[#allocation20_spill]] %s3740_s1 }
   0x2   :  { %3755 = sst [smem:[#allocation21_spill]] %s3742_s3 }
   0x3   :  { %3756 = sst [smem:[#allocation22_spill]] %s3743_s4 }
   0x4   :  { %3757 = sst [smem:[#allocation23_spill]] %s3749_s10 }
   0x5   :  { %15 = vsyncpa [#allocation3], 0 }
   0x6   :  { %17 = vsyncpa [#allocation3 + $0x1], 0 }
   0x7   :  { %18 = vsyncpa [#allocation6], 0 }
   0x8   :  { %19 = vsyncpa [#allocation9], 0 }
   0x9   :  { %20 = vsyncpa [#allocation12], 0 }
   0xa   :  { %21 = vsyncpa [#allocation4], 0 }
   0xb   :  { %23 = vsyncpa [#allocation4 + $0x1], 0  ;;  %s3236_s13 = smov 0   ;;  %s3238_s14 = smov 0  }
   0xc   :  { %s3240_s15 = smov 0   ;;  %s3242_s16 = smov 0  }
   0xd LB: > { %s3154_s17 = smov [#allocation5]   ;;  %s3257_s19 = sadd.s32 4294967295, %s3152_s16   ;;  %s3152_s16 = sphi %s3242_s16, %s3786_s16   ;;  %s3148_s15 = sphi %s3240_s15, %s3785_s15   ;;  %s3144_s14 = sphi %s3238_s14, %s3784_s14   ;;  %s3140_s13 = sphi %s3236_s13, %s3783_s13  }
   0xe   : > { %s288_s18 = sshll.u32 %s3154_s17, 4  ;;  %p2370_p0 = scmp.ge.s32.totalorder %s3152_s16, 1  ;;  %s289_s18 = int_to_ptr.vmem [resolvable:$true] %s288_s18 }
   0xf   : > { %p3750_p1 = scmp.eq.s32.totalorder %s3257_s19, 0  ;;  %p275_p2 = scmp.lt.s32.totalorder %s3152_s16, 3 }
  0x10   : > { %s3155_s21 = smov [#allocation8]   ;;  %s3156_s24 = smov [#allocation11]  }
  0x11   : > { %p3262_p3 = pnand %p2370_p0, %p275_p2  ;;  %s309_s22 = sshll.u32 %s3155_s21, 4  ;;  %s3269_s22 = int_to_ptr.vmem [resolvable:$true] %s309_s22 }
  0x12   : > { %s3277_s25 = sshll.u32 %s3156_s24, 4  ;;  %s3760_s1 = sld [smem:[#allocation20_spill]]  ;;  %s339_s25 = int_to_ptr.vmem [resolvable:$true] %s3277_s25 }
  0x13   : > { %s3758_s20 = scalar_select %p3262_p3, 1, 0 }
  0x14   : > { %p2686_p5 = pneg %p3262_p3 }
  0x16   : > { %p3273_p6 = pnand %p2686_p5, %p3750_p1 }
  0x18   : > { %s2876_s28 = scalar_lea.hbm %s3760_s1, 16  ;;  %p3287_p8 = pneg %p3273_p6 }
  0x19   : > { %p2877_p7 = scmp.ne.s32.totalorder %s3760_s1, %s2876_s28  ;;  %p2883_p11 = scmp.lt.u32.totalorder %s2876_s28, %s3760_s1 }
  0x1b   : > { %p2879_p9 = pnand %p3287_p8, %p2877_p7 }
  0x1d   : > { %p2880_p10 = pneg %p2879_p9 }
  0x1f   : > { %p2885_p12 = pnand %p2883_p11, %p2880_p10 }
  0x21   : > { %2888 = shalt.err (!%p2885_p12)
}
  0x22   : > { %s2889_s21 = scalar_lea.vmem %s289_s18, 16  ;;  %s2896_s24 = scalar_lea.vmem %s289_s18, 32 }
  0x23   : > { %p2890_p13 = scmp.ne.s32.totalorder %s289_s18, %s2889_s21  ;;  %p2897_p5 = scmp.lt.s32.totalorder %s289_s18, %s289_s18 }
  0x24   : > { %p2898_p4 = scmp.lt.s32.totalorder %s2896_s24, %s2889_s21 }
  0x25   : > { %p2892_p0 = pnand %p2890_p13, %p3287_p8 }
  0x26   : > { %p2899_p1 = por %p2898_p4, %p2897_p5 }
  0x27   : > { %p2893_p2 = pneg %p2892_p0 }
  0x29   : > { %p2900_p3 = pnand %p2899_p1, %p2893_p2 }
  0x2b   : > { %2903 = shalt.err (!%p2900_p3)
}
  0x2c   : > { %2689 = dma.hbm_to_vmem [thread:$0]  (!%p3273_p6), %s3760_s1, 16, %s289_s18, [#allocation6]  }
  0x2d   : > { %s3762_s3 = sld [smem:[#allocation21_spill]] }
  0x33   : > { %s2904_s30 = scalar_lea.hbm %s3762_s3, 1024 }
  0x34   : > { %p2905_p7 = scmp.ne.s32.totalorder %s3762_s3, %s2904_s30  ;;  %p2911_p1 = scmp.lt.u32.totalorder %s2904_s30, %s3762_s3 }
  0x36   : > { %p2907_p9 = pnand %p2905_p7, %p3287_p8 }
  0x38   : > { %p2908_p4 = pneg %p2907_p9 }
  0x3a   : > { %p2913_p3 = pnand %p2911_p1, %p2908_p4 }
  0x3c   : > { %2916 = shalt.err (!%p2913_p3)
}
  0x3d   : > { %s2917_s18 = scalar_lea.vmem %s3269_s22, 1024  ;;  %p2925_p13 = scmp.lt.s32.totalorder %s3269_s22, %s3269_s22 }
  0x3e   : > { %p2918_p10 = scmp.ne.s32.totalorder %s3269_s22, %s2917_s18  ;;  %p2926_p0 = scmp.lt.s32.totalorder %s2917_s18, %s2917_s18 }
  0x40   : > { %p2920_p11 = pnand %p2918_p10, %p3287_p8  ;;  %p2927_p2 = por %p2926_p0, %p2925_p13 }
  0x42   : > { %p2921_p12 = pneg %p2920_p11 }
  0x44   : > { %p2928_p5 = pnand %p2927_p2, %p2921_p12 }
  0x46   : > { %2931 = shalt.err (!%p2928_p5)
}
  0x47   : > { %s3157_s26 = smov 256   ;;  %s3158_s27 = smov 16  }
  0x48   : > { %2695 = dma.hbm_to_vmem [thread:$0]  (!%p3273_p6), %s3762_s3, 1024, %s3269_s22, [#allocation9], %s3157_s26, %s3157_s26, %s3158_s27  }
  0x49   : > { %s2932_s17 = scalar_lea.hbm %s3745_s6, 512 }
  0x4a   : > { %p2933_p7 = scmp.ne.s32.totalorder %s3745_s6, %s2932_s17  ;;  %p2939_p1 = scmp.lt.u32.totalorder %s2932_s17, %s3745_s6 }
  0x4c   : > { %p2935_p9 = pnand %p2933_p7, %p3287_p8 }
  0x4e   : > { %p2936_p4 = pneg %p2935_p9 }
  0x50   : > { %p2941_p3 = pnand %p2939_p1, %p2936_p4 }
  0x52   : > { %2944 = shalt.err (!%p2941_p3)
}
  0x53   : > { %s2945_s28 = scalar_lea.vmem %s339_s25, 512  ;;  %p2953_p13 = scmp.lt.s32.totalorder %s339_s25, %s339_s25 }
  0x54   : > { %p2946_p10 = scmp.ne.s32.totalorder %s339_s25, %s2945_s28  ;;  %p2954_p0 = scmp.lt.s32.totalorder %s2945_s28, %s2945_s28 }
  0x56   : > { %p2948_p11 = pnand %p2946_p10, %p3287_p8  ;;  %p2955_p2 = por %p2954_p0, %p2953_p13 }
  0x58   : > { %p2949_p12 = pneg %p2948_p11 }
  0x5a   : > { %p2956_p5 = pnand %p2955_p2, %p2949_p12 }
  0x5c   : > { %2959 = shalt.err (!%p2956_p5)
}
  0x5d   : > { %s3159_s22 = smov 128   ;;  %s3160_s26 = smov 8  }
  0x5e   : > { %2701 = dma.hbm_to_vmem [thread:$0]  (!%p3273_p6), %s3745_s6, 512, %s339_s25, [#allocation12], %s3159_s22, %s3159_s22, %s3160_s26  }
  0x5f   : > { %s3161_s29 = smov [#allocation7]   ;;  %s3162_s12 = smov [#allocation10]  }
  0x60   : > { %s299_s30 = sshll.u32 %s3161_s29, 4  ;;  %s325_s17 = sshll.u32 %s3162_s12, 4  ;;  %s300_s30 = int_to_ptr.vmem [resolvable:$true] %s299_s30  ;;  %s326_s17 = int_to_ptr.vmem [resolvable:$true] %s325_s17 }
  0x61   : > { %s2960_s18 = scalar_lea.hbm %s3741_s2, 16 }
  0x62   : > { %p2961_p7 = scmp.ne.s32.totalorder %s3741_s2, %s2960_s18  ;;  %p2967_p1 = scmp.lt.u32.totalorder %s2960_s18, %s3741_s2 }
  0x64   : > { %p2963_p9 = pnand %p2961_p7, %p3287_p8 }
  0x66   : > { %p2964_p4 = pneg %p2963_p9 }
  0x68   : > { %p2969_p3 = pnand %p2967_p1, %p2964_p4 }
  0x6a   : > { %2972 = shalt.err (!%p2969_p3)
}
  0x6b   : > { %s2973_s25 = scalar_lea.vmem %s300_s30, 16  ;;  %s2980_s1 = scalar_lea.vmem %s300_s30, 32 }
  0x6c   : > { %p2974_p10 = scmp.ne.s32.totalorder %s300_s30, %s2973_s25  ;;  %p2981_p13 = scmp.lt.s32.totalorder %s300_s30, %s300_s30 }
  0x6d   : > { %p2982_p0 = scmp.lt.s32.totalorder %s2980_s1, %s2973_s25 }
  0x6e   : > { %p2976_p11 = pnand %p2974_p10, %p3287_p8 }
  0x6f   : > { %p2983_p2 = por %p2982_p0, %p2981_p13 }
  0x70   : > { %p2977_p12 = pneg %p2976_p11 }
  0x72   : > { %p2984_p5 = pnand %p2983_p2, %p2977_p12 }
  0x74   : > { %2987 = shalt.err (!%p2984_p5)
}
  0x75   : > { %2692 = dma.hbm_to_vmem [thread:$0]  (!%p3273_p6), %s3741_s2, 16, %s300_s30, [#allocation6]  }
  0x76   : > { %s2988_s29 = scalar_lea.hbm %s3744_s5, 512 }
  0x77   : > { %p2989_p7 = scmp.ne.s32.totalorder %s3744_s5, %s2988_s29  ;;  %p2995_p1 = scmp.lt.u32.totalorder %s2988_s29, %s3744_s5 }
  0x79   : > { %p2991_p9 = pnand %p2989_p7, %p3287_p8 }
  0x7b   : > { %p2992_p4 = pneg %p2991_p9 }
  0x7d   : > { %p2997_p3 = pnand %p2995_p1, %p2992_p4 }
  0x7f   : > { %3000 = shalt.err (!%p2997_p3)
}
  0x80   : > { %s3001_s28 = scalar_lea.vmem %s326_s17, 512  ;;  %p3009_p13 = scmp.lt.s32.totalorder %s326_s17, %s326_s17 }
  0x81   : > { %p3002_p10 = scmp.ne.s32.totalorder %s326_s17, %s3001_s28  ;;  %p3010_p0 = scmp.lt.s32.totalorder %s3001_s28, %s3001_s28 }
  0x83   : > { %p3004_p11 = pnand %p3002_p10, %p3287_p8  ;;  %p3011_p2 = por %p3010_p0, %p3009_p13 }
  0x85   : > { %p3005_p12 = pneg %p3004_p11 }
  0x87   : > { %p3012_p5 = pnand %p3011_p2, %p3005_p12 }
  0x89   : > { %3015 = shalt.err (!%p3012_p5)
}
  0x8a   : > { %2698 = dma.hbm_to_vmem [thread:$0]  (!%p3273_p6), %s3744_s5, 512, %s326_s17, [#allocation9], %s3159_s22, %s3159_s22, %s3160_s26  }
  0x8b   : > { %s3163_s1 = smov [#allocation13]   ;;  %s3016_s10 = scalar_lea.hbm %s3746_s7, 16 }
  0x8c   : > { %s352_s3 = sshll.u32 %s3163_s1, 4  ;;  %p3017_p7 = scmp.ne.s32.totalorder %s3746_s7, %s3016_s10  ;;  %s353_s3 = int_to_ptr.vmem [resolvable:$true] %s352_s3 }
  0x8d   : > { %p3023_p1 = scmp.lt.u32.totalorder %s3016_s10, %s3746_s7 }
  0x8e   : > { %p3019_p9 = pnand %p3017_p7, %p3287_p8 }
  0x90   : > { %p3020_p4 = pneg %p3019_p9 }
  0x92   : > { %p3025_p3 = pnand %p3023_p1, %p3020_p4 }
  0x94   : > { %3028 = shalt.err (!%p3025_p3)
}
  0x95   : > { %s3029_s17 = scalar_lea.vmem %s353_s3, 16  ;;  %s3036_s18 = scalar_lea.vmem %s353_s3, 32 }
  0x96   : > { %p3030_p10 = scmp.ne.s32.totalorder %s353_s3, %s3029_s17  ;;  %p3037_p13 = scmp.lt.s32.totalorder %s353_s3, %s353_s3 }
  0x97   : > { %p3038_p0 = scmp.lt.s32.totalorder %s3036_s18, %s3029_s17 }
  0x98   : > { %p3032_p11 = pnand %p3030_p10, %p3287_p8 }
  0x99   : > { %p3039_p2 = por %p3038_p0, %p3037_p13 }
  0x9a   : > { %p3033_p12 = pneg %p3032_p11 }
  0x9c   : > { %p3040_p5 = pnand %p3039_p2, %p3033_p12 }
  0x9e   : > { %3043 = shalt.err (!%p3040_p5)
}
  0x9f   : > { %2704 = dma.hbm_to_vmem [thread:$0]  (!%p3273_p6), %s3746_s7, 16, %s353_s3, [#allocation12]  }
  0xa0   : > { %s2369_s11 = sadd.s32 4294967294, %s3152_s16   ;;  %s3407_s23 = sadd.s32 1, %s3152_s16  }
  0xa1   : > { %s33_s25 = ssub.s32 %s3152_s16, %s3407_s23  ;;  %s36_s1 = sadd.s32 1, %s3148_s15 }
  0xa2   : > { %p34_p8 = scmp.eq.s32.totalorder %s33_s25, 0  ;;  %p43_p7 = scmp.ne.s32.totalorder %s3148_s15, %s3144_s14 }
  0xa3   : > { %p44_p9 = scmp.eq.s32.totalorder %s3152_s16, 0  ;;  %p49_p4 = scmp.ne.s32.totalorder %s3144_s14, %s3140_s13 }
  0xa4   : > { %s3418_s27 = scalar_select %p34_p8, %s3148_s15, %s36_s1  }
  0xa5   : > { %p3420_p1 = por %p44_p9, %p43_p7  ;;  %p3764_p3 = scmp.eq.s32.totalorder %s3257_s19, 0 }
  0xa6   : > { %p262_p10 = scmp.eq.s32.totalorder %s3257_s19, 1  ;;  %p268_p11 = scmp.eq.s32.totalorder %s2369_s11, 1 }
  0xa7   : > { %p3426_p6 = por %p3764_p3, %p49_p4  ;;  %p2719_p12 = scmp.lt.s32.totalorder %s3152_s16, 2 }
  0xa8   : > { %s369_s10 = sand.u32 1, %s3148_s15   ;;  %p3433_p13 = por %p262_p10, %p43_p7 }
  0xa9   : > { %p3437_p0 = por %p268_p11, %p49_p4  ;;  %s2378_s21 = sshll.u32 %s369_s10, 4 }
  0xaa   : > { %s3766_s29 = scalar_select %p3433_p13, 1, 0 }
  0xab   : > { %s3767_s12 = scalar_select %p3437_p0, 1, 0 }
  0xac   : > { %s2440_s24 = sshll.u32 %s3152_s16, 8  ;;  %s373_s30 = scalar_lea.vmem [#allocation2], %s2378_s21 }
  0xad   : > { %s3445_s28 = scalar_lea.hbm %s3739_s0, %s2440_s24  ;;  %s380_s11 = sshll.u32 %s373_s30, 4  ;;  %s3447_s11 = int_to_ptr.vmem [resolvable:$true] %s380_s11 }
  0xae   : > { %p3451_p2 = pnand %p2719_p12, %p3420_p1  ;;  %s3455_s1 = scalar_lea.sflag [#allocation3], %s369_s10 }
  0xaf   : > { %s3044_s17 = scalar_lea.hbm %s3445_s28, 256  ;;  %s3049_s4 = scalar_lea.hbm %s3739_s0, 512 }
  0xb0   : > { %p3045_p5 = scmp.ne.s32.totalorder %s3445_s28, %s3044_s17  ;;  %p3046_p8 = pneg %p3451_p2 }
  0xb1   : > { %p3050_p4 = scmp.lt.u32.totalorder %s3445_s28, %s3739_s0  ;;  %p3051_p1 = scmp.lt.u32.totalorder %s3049_s4, %s3044_s17 }
  0xb2   : > { %p3047_p7 = pnand %p3046_p8, %p3045_p5  ;;  %p3053_p10 = scmp.lt.u32.totalorder %s3044_s17, %s3445_s28 }
  0xb3   : > { %p3052_p3 = por %p3051_p1, %p3050_p4 }
  0xb4   : > { %p3048_p9 = pneg %p3047_p7 }
  0xb5   : > { %p3054_p11 = por %p3053_p10, %p3052_p3 }
  0xb7   : > { %p3055_p12 = pnand %p3054_p11, %p3048_p9 }
  0xb9   : > { %3058 = shalt.err (!%p3055_p12)
}
  0xba   : > { %s3059_s10 = scalar_lea.vmem %s3447_s11, 256  ;;  %s3164_s21 = smov [#allocation2]  }
  0xbb   : > { %p3060_p5 = scmp.ne.s32.totalorder %s3447_s11, %s3059_s10  ;;  %s3064_s24 = sshll.u32 %s3164_s21, 4  ;;  %s3065_s24 = int_to_ptr.vmem [resolvable:$false] %s3064_s24 }
  0xbc   : > { %s3066_s18 = scalar_lea.vmem %s3065_s24, 512  ;;  %p3067_p13 = scmp.lt.s32.totalorder %s3447_s11, %s3065_s24 }
  0xbd   : > { %p3062_p7 = pnand %p3060_p5, %p3046_p8  ;;  %p3068_p4 = scmp.lt.s32.totalorder %s3066_s18, %s3059_s10 }
  0xbf   : > { %p3063_p0 = pneg %p3062_p7  ;;  %p3069_p1 = por %p3068_p4, %p3067_p13 }
  0xc1   : > { %p3070_p3 = pnand %p3069_p1, %p3063_p0 }
  0xc3   : > { %3073 = shalt.err (!%p3070_p3)
}
  0xc4   : > { %2708 = dma.hbm_to_vmem [thread:$0]  (!%p3451_p2), %s3445_s28, 256, %s3447_s11, %s3455_s1, %s3159_s22, %s3159_s22, %s3160_s26  }
  0xc5   : > { %p3769_p8 = scmp.ne.s32.totalorder %s3758_s20, 0 }
  0xc6   : > { %s3489_s17 = sand.u32 (!%p3769_p8), 1, %s3144_s14  }
  0xc7   : > { %392 = sbr.rel (%p3769_p8) target bundleno = 2715 (0xa9b), region = 60  ;;  %s2382_s4 = sshll.u32 (!%p3769_p8), %s3489_s17, 4 }
  0xc8   : > { %s395_s30 = scalar_lea.sflag (!%p3769_p8), [#allocation3], %s3489_s17  ;;  %s398_s25 = scalar_lea.vmem (!%p3769_p8), [#allocation2], %s2382_s4 }
  0xce   : > { %3119 = dma.done.wait (%p3426_p6), %s395_s30, 256  }
  0xcf   : > { %3121 = vsyncadd (%p3426_p6), %s395_s30, 4294967040  ;;  %p3770_p13 = scmp.eq.s32.totalorder %s3257_s19, 0 }
  0xd1   : > { %3123 = dma.done.wait (%p3770_p13), [#allocation6], 32   ;;  %p3771_p0 = pmov %p3770_p13 }
  0xd3   : > { %3125 = vsyncadd (%p3771_p0), [#allocation6], 4294967264  ;;  %p3772_p2 = pmov %p3771_p0 }
  0xd4   : > { %p3773_p9 = pmov %p3771_p0 }
  0xd5   : > { %3127 = dma.done.wait (%p3772_p2), [#allocation9], 1536  }
  0xd6   : > { %3129 = vsyncadd (%p3773_p9), [#allocation9], 4294965760  ;;  %p3774_p10 = pmov %p3771_p0 }
  0xd7   : > { %p3775_p11 = pmov %p3771_p0 }
  0xd8   : > { %3131 = dma.done.wait (%p3774_p10), [#allocation12], 528  }
  0xd9   : > { %3133 = vsyncadd (%p3775_p11), [#allocation12], 4294966768  ;;  %vm463_vm0 = vcmask 261120   ;;  %v3511_v0 = vld [vmem:[%s398_s25] sm:$0xff]  ;;  %v3513_v1 = vld [vmem:[%s398_s25 + $0x8] sm:$0xff]  ;;  %v3165_v21 = vmov 0.0   ;;  %v519_v46 = vlaneseq }
  0xda   : > { %v464_v2 = vsel %vm463_vm0, %v3511_v0, 0.0  ;;  %v467_v3 = vsel %vm463_vm0, %v3513_v1, 0.0  ;;  %v510_v14 = vld [vmem:[#allocation8 + $0x8] sm:$0xff]  ;;  %v512_v15 = vld [vmem:[#allocation8 + $0x18] sm:$0xff]  ;;  %v509_v16 = vld [vmem:[#allocation8] sm:$0xff]  ;;  %599 = vmatprep.mubr.f32.mxu1 %v3165_v21  ;;  %s3166_s28 = smov 32  }
  0xdb   : > { %465 = vadd.xlane.f32.xlu0 %v464_v2  ;;  %v2594_v17 = vpack.c.bf16 %v512_v15, %v510_v14  ;;  %v511_v18 = vld [vmem:[#allocation8 + $0x10] sm:$0xff]  ;;  %v514_v19 = vld [vmem:[#allocation8 + $0x28] sm:$0xff]  ;;  %v516_v20 = vld [vmem:[#allocation8 + $0x38] sm:$0xff]  ;;  %s3167_s10 = smov 96   ;;  %v520_v47 = vshrl.u32 %v519_v46, 7  ;;  %s3776_s18 = sld [smem:[#allocation22_spill]] }
  0xdc   : > { %v2596_v22 = vpack.c.bf16 %v511_v18, %v509_v16  ;;  %v2598_v23 = vpack.c.bf16 %v516_v20, %v514_v19  ;;  %v513_v24 = vld [vmem:[#allocation8 + $0x20] sm:$0xff]  ;;  %v515_v25 = vld [vmem:[#allocation8 + $0x30] sm:$0xff]  ;;  %v2390_v37 = vld [vmem:[#allocation5] ss:$0 sm:$0xff]  ;;  %s3168_s20 = smov 88   ;;  %vm675_vm1 = vcmask 64512  }
  0xdd   : > { %2595 = vmatprep.subr.bf16.mxu1 %v2594_v17  ;;  %v2600_v26 = vpack.c.bf16 %v515_v25, %v513_v24  ;;  %v3526_v27 = vld [vmem:[%s3747_s8] sm:$0xff]  ;;  %v3531_v28 = vld [vmem:[%s3747_s8 + $0x8] sm:$0xff]  ;;  %v525_v48 = vsub.s32 1, %v520_v47  ;;  %v521_v51 = vsub.s32 0, %v520_v47  ;;  %s3169_s22 = smov 120   ;;  %s3170_s26 = smov 80   ;;  %vm3573_vm2 = vmpackc.low %vm675_vm1, %vm675_vm1 }
  0xde   : > { %2597 = vmatpush1.bf16.msra.mxu1 %v2596_v22  ;;  %v614_v29 = vld [vmem:[%s3748_s9] sm:$0xff]  ;;  %v615_v60 = vld [vmem:[%s3748_s9 + $0x8] sm:$0xff]  ;;  %s3171_s3 = smov 112   ;;  %vm761_vm3 = vcmask 130048   ;;  %s3173_s11 = smov 48  }
  0xdf   : > { %468 = vadd.xlane.f32.xlu0 %v467_v3  ;;  %2599 = vmatprep.subr.bf16.mxu1 %v2598_v23  ;;  %v2391_v39 = vld [vmem:[#allocation7] ss:$0 sm:$0xff]  ;;  %s3174_s1 = smov 104   ;;  %s3176_s21 = smov 56  }
  0xe0   : > { %s3177_s24 = smov 40   ;;  %s2441_s25 = sshll.u32 %s3257_s19, 8 }
  0xe1   : > { %v517_v49 = vld [vmem:[%s3776_s18] sm:$0x3]  ;;  %s458_s18 = scalar_lea.vmem [#allocation14], %s2382_s4  ;;  %s2226_s4 = scalar_lea.sflag [#allocation4], %s3489_s17 }
  0xe2   : > { %2601 = vmatpush1.bf16.msra.mxu1 %v2600_v26  ;;  %v526_v50 = vrot.slane %v517_v49, %v525_v48  ;;  %v522_v55 = vrot.slane %v517_v49, %v521_v51  ;;  %s2239_s30 = sshll.u32 %s458_s18, 4  ;;  %p3780_p12 = scmp.ne.s32.totalorder %s3766_s29, 0  ;;  %s3688_s30 = int_to_ptr.vmem [resolvable:$true] %s2239_s30 }
  0xe3   : > { %s3074_s19 = scalar_lea.vmem %s3688_s30, 256 }
  0xe4   : > { %p3075_p6 = scmp.ne.s32.totalorder %s3688_s30, %s3074_s19 }
  0xe6   : > { %p3076_p5 = pnand %p3075_p6, %p3780_p12 }
  0xe8   : > { %p3077_p7 = pneg %p3076_p5 }
  0xf5   : > { %640 = vrot.lane.b32.xlu0 %v3526_v27, %s3166_s28 }
  0xf9   : > { %620 = vrot.lane.b32.xlu0 %v614_v29, %s3167_s10 }
 0x168   : > { %v466_v4 = vpop.xlane.xlu0 %465 }
 0x169   : > { %v471_v5 = vmul.f32 0.03125, %v466_v4 }
 0x16b   : > { %v473_v6 = vsub.f32 %v3511_v0, %v471_v5 }
 0x16c   : > { %v469_v7 = vpop.xlane.xlu0 %468 }
 0x16d   : > { %v472_v8 = vmul.f32 0.03125, %v469_v7  ;;  %v475_v9 = vmul.f32 %v473_v6, %v473_v6 }
 0x16f   : > { %v474_v10 = vsub.f32 %v3513_v1, %v472_v8  ;;  %v477_v11 = vsel %vm463_vm0, %v475_v9, 0.0 }
 0x170   : > { %478 = vadd.xlane.f32.xlu1 %v477_v11  ;;  %v641_v62 = vpop.permute.xlu0 %640 }
 0x171   : > { %v476_v12 = vmul.f32 %v474_v10, %v474_v10 }
 0x173   : > { %v480_v13 = vsel %vm463_vm0, %v476_v12, 0.0 }
 0x174   : > { %481 = vadd.xlane.f32.xlu1 %v480_v13  ;;  %v621_v3 = vpop.permute.xlu0 %620 }
 0x185   : > { %642 = vrot.lane.b32.xlu1 %v3531_v28, %s3166_s28 }
 0x1fd   : > { %v479_v30 = vpop.xlane.xlu1 %478 }
 0x1fe   : > { %v483_v31 = vmul.f32 0.03125, %v479_v30 }
 0x200   : > { %v485_v32 = vadd.f32 1e-06, %v483_v31 }
 0x201   : > { %v482_v33 = vpop.xlane.xlu1 %481 }
 0x202   : > { %2824 = vrsqrt.f32 %v485_v32  ;;  %v484_v34 = vmul.f32 0.03125, %v482_v33 }
 0x204   : > { %v486_v35 = vadd.f32 1e-06, %v484_v34 }
 0x205   : > { %v643_v5 = vpop.permute.xlu1 %642 }
 0x206   : > { %2826 = vrsqrt.f32 %v486_v35 }
 0x20c   : > { %v2825_v36 = vpop.eup %2824 }
 0x20d   : > { %v489_v38 = vmul.f32 %v2825_v36, %v473_v6 }
 0x20f   : > { %v498_v40 = vmul.f32 %v2390_v37, %v489_v38 }
 0x210   : > { %v2827_v41 = vpop.eup %2826 }
 0x211   : > { %v507_v42 = vadd.f32 %v2391_v39, %v498_v40  ;;  %v490_v43 = vmul.f32 %v2827_v41, %v474_v10 }
 0x213   : > { %2392 = vmatmul.mubr.msk.f32.vlgmr.msra.gmra.mrb[0].mxu1 %vm463_vm0, %v507_v42  ;;  %v499_v44 = vmul.f32 %v2390_v37, %v490_v43 }
 0x214   : > { %605 = vmatprep.mubr.f32.mxu1 %v3165_v21 }
 0x215   : > { %v508_v45 = vadd.f32 %v2391_v39, %v499_v44 }
 0x217   : > { %2393 = vmatmul.mubr.msk.f32.gmra.mrb[2].mxu1 %vm463_vm0, %v508_v45 }
 0x2e6   : > { %v601_v52 = vpop.f32.mrb[0].mxu1 }
 0x2e7   : > { %v603_v53 = vpop.f32.mrb[1].mxu1  ;;  %v3553_v2 = vadd.f32 %v601_v52, %v522_v55 }
 0x2e8   : > { %v604_v54 = vadd.f32 %v603_v53, %v526_v50 }
 0x2e9   : > { %v626_v4 = vmul.f32 %v621_v3, %v3553_v2  ;;  %v646_v8 = vmul.f32 %v641_v62, %v3553_v2  ;;  %v616_v15 = vmul.f32 %v3526_v27, %v3553_v2 }
 0x2ea   : > { %v648_v56 = vmul.f32 %v614_v29, %v604_v54  ;;  %v607_v57 = vpop.f32.mrb[2].mxu1 }
 0x2eb   : > { %v3546_v58 = vadd.f32 %v607_v57, %v522_v55  ;;  %v609_v59 = vpop.f32.mrb[3].mxu1 }
 0x2ec   : > { %v610_v61 = vadd.f32 %v609_v59, %v526_v50  ;;  %652 = vrot.lane.b32.xlu1 %v648_v56, %s3166_s28 }
 0x2ed   : > { %v647_v7 = vmul.f32 %v643_v5, %v3546_v58  ;;  %v617_v26 = vmul.f32 %v3531_v28, %v3546_v58  ;;  %v3600_v42 = vpack.i.bf16 %v3546_v58, %v3553_v2 }
 0x2ee   : > { %v649_v63 = vmul.f32 %v615_v60, %v610_v61 }
 0x2f0   : > { %654 = vrot.lane.b32.xlu1 %v649_v63, %s3166_s28 }
 0x2f4   : > { %622 = vrot.lane.b32.xlu1 %v615_v60, %s3167_s10 }
 0x2f8   : > { %630 = vrot.lane.b32.xlu1 %v626_v4, %s3166_s28 }
 0x35e   : > { %v653_v6 = vpop.permute.xlu1 %652 }
 0x35f   : > { %v658_v10 = vadd.f32 %v653_v6, %v646_v8 }
 0x362   : > { %v655_v9 = vpop.permute.xlu1 %654 }
 0x363   : > { %v659_v11 = vadd.f32 %v655_v9, %v647_v7 }
 0x365   : > { %v3560_v12 = vpack.i.bf16 %v659_v11, %v658_v10 }
 0x366   : > { %v623_v13 = vpop.permute.xlu1 %622 }
 0x367   : > { %2785 = vrot.lane.b32.xlu0 %v3560_v12, %s3167_s10  ;;  %2790 = vrot.lane.b32.xlu1 %v3560_v12, %s3168_s20  ;;  %v627_v14 = vmul.f32 %v623_v13, %v3546_v58  ;;  %s3175_s10 = smov 72  }
 0x36a   : > { %v631_v16 = vpop.permute.xlu1 %630 }
 0x36b   : > { %v636_v17 = vadd.f32 %v631_v16, %v616_v15  ;;  %632 = vrot.lane.b32.xlu0 %v627_v14, %s3166_s28  ;;  %s3172_s28 = smov 64  }
 0x36d   : > { %1059 = vrot.lane.b32.xlu1 %v636_v17, %s3169_s22  ;;  %2502 = vmatprep.mubr.msk.f32.mxu1 %vm675_vm1, %v636_v17 }
 0x36f   : > { %2795 = vrot.lane.b32.xlu0 %v3560_v12, %s3170_s26  ;;  %s3779_s26 = sld [smem:[#allocation23_spill]] }
 0x371   : > { %1447 = vrot.lane.b32.xlu1 %v636_v17, %s3171_s3 }
 0x3d9   : > { %v2791_v18 = vpop.permute.xlu1 %2790  ;;  %v2786_v19 = vpop.permute.xlu0 %2785 }
 0x3da   : > { %v2793_v20 = vunpack.i.h.bf16 %v2791_v18  ;;  %v2792_v21 = vunpack.i.l.bf16 %v2791_v18  ;;  %v2788_v22 = vunpack.i.h.bf16 %v2786_v19  ;;  %v2787_v23 = vunpack.i.l.bf16 %v2786_v19 }
 0x3dc   : > { %v2602_v25 = vpack.c.bf16 %v2788_v22, %v2787_v23  ;;  %v2612_v29 = vpack.c.bf16 %v2793_v20, %v2792_v21 }
 0x3dd   : > { %v633_v27 = vpop.permute.xlu0 %632 }
 0x3de   : > { %v637_v30 = vadd.f32 %v633_v27, %v617_v26  ;;  %2604 = vmatprep.subr.msk.bf16.mxu1 %vm3573_vm2, %v2602_v25 }
 0x3df   : > { %2607 = vmatpush3.bf16.xpose.msk.msra.mxu1 %vm3573_vm2, %v2602_v25  ;;  %v1060_v34 = vpop.permute.xlu1 %1059 }
 0x3e0   : > { %1061 = vrot.lane.b32.xlu0 %v637_v30, %s3169_s22  ;;  %2614 = vmatprep.subr.msk.bf16.mxu1 %vm3573_vm2, %v2612_v29 }
 0x3e1   : > { %v2796_v31 = vpop.permute.xlu0 %2795 }
 0x3e2   : > { %v2798_v32 = vunpack.i.h.bf16 %v2796_v31  ;;  %v2797_v33 = vunpack.i.l.bf16 %v2796_v31 }
 0x3e3   : > { %v1448_v36 = vpop.permute.xlu1 %1447 }
 0x3e4   : > { %1449 = vrot.lane.b32.xlu0 %v637_v30, %s3171_s3  ;;  %v2622_v35 = vpack.c.bf16 %v2798_v32, %v2797_v33  ;;  %v891_v33 = vld [vmem:[#allocation10] sm:$0xff]  ;;  %s3693_s3 = scalar_lea.hbm %s3779_s26, %s2441_s25 }
 0x3e6   : > { %2503 = vmatmul.mubr.msk.f32.vlgmr.msra.gmra.mrb[4].mxu1 %vm675_vm1, %v637_v30 }
 0x3e7   : > { %2617 = vmatpush3.bf16.xpose.msk.msra.mxu1 %vm3573_vm2, %v2612_v29  ;;  %2526 = vmatprep.mubr.msk.f32.mxu1 %vm675_vm1, %v1060_v34  ;;  %v975_v34 = vld [vmem:[#allocation11] sm:$0xff] }
 0x3e8   : > { %2624 = vmatprep.subr.msk.bf16.mxu1 %vm3573_vm2, %v2622_v35 }
 0x452   : > { %v1062_v28 = vpop.permute.xlu0 %1061 }
 0x453   : > { %2527 = vmatmul.mubr.msk.f32.vlgmr.msra.gmra.mrb[6].mxu1 %vm675_vm1, %v1062_v28 }
 0x454   : > { %2627 = vmatpush3.bf16.xpose.msk.msra.mxu1 %vm3573_vm2, %v2622_v35  ;;  %2550 = vmatprep.mubr.msk.f32.mxu1 %vm675_vm1, %v1448_v36 }
 0x456   : > { %v1450_v37 = vpop.permute.xlu0 %1449 }
 0x45b   : > { %2551 = vmatmul.mubr.msk.f32.vlgmr.msra.gmra.mrb[8].mxu1 %vm675_vm1, %v1450_v37 }
 0x4b9   : > { %v2504_v38 = vpop.f32.mrb[4].mxu1 }
 0x4ba   : > { %v752_v39 = vpop.f32.mrb[5].mxu1  ;;  %v765_v40 = vsel %vm761_vm3, %v2504_v38, -inf }
 0x4bb   : > { %766 = vmax.xlane.f32.xlu0 %v765_v40  ;;  %v762_v41 = vsel %vm761_vm3, %v752_v39, -inf }
 0x4bc   : > { %763 = vmax.xlane.f32.xlu1 %v762_v41 }
 0x4cd   : > { %2800 = vrot.lane.b32.xlu1 %v3600_v42, %s3172_s28  ;;  %s3178_s28 = smov [#allocation14]  }
 0x4d1   : > { %2805 = vrot.lane.b32.xlu1 %v3600_v42, %s3173_s11  ;;  %s3078_s11 = sshll.u32 %s3178_s28, 4  ;;  %s3079_s11 = int_to_ptr.vmem [resolvable:$false] %s3078_s11 }
 0x4d2   : > { %p3081_p4 = scmp.lt.s32.totalorder %s3688_s30, %s3079_s11 }
 0x4d5   : > { %1835 = vrot.lane.b32.xlu1 %v636_v17, %s3174_s1 }
 0x4d9   : > { %1837 = vrot.lane.b32.xlu1 %v637_v30, %s3174_s1  ;;  %s3080_s1 = scalar_lea.vmem %s3079_s11, 512 }
 0x4da   : > { %p3082_p1 = scmp.lt.s32.totalorder %s3080_s1, %s3074_s19 }
 0x4dc   : > { %p3083_p3 = por %p3082_p1, %p3081_p4 }
 0x4de   : > { %p3084_p8 = pnand %p3083_p3, %p3077_p7 }
 0x526   : > { %v3604_v43 = vpop.f32.mrb[6].mxu1 }
 0x527   : > { %v1141_v44 = vpop.f32.mrb[7].mxu1  ;;  %v1153_v32 = vsel %vm761_vm3, %v3604_v43, -inf }
 0x528   : > { %v1150_v45 = vsel %vm761_vm3, %v1141_v44, -inf }
 0x529   : > { %1151 = vmax.xlane.f32.xlu1 %v1150_v45 }
 0x52e   : > { %v2552_v46 = vpop.f32.mrb[8].mxu1 }
 0x52f   : > { %v1529_v47 = vpop.f32.mrb[9].mxu1  ;;  %v1541_v5 = vsel %vm761_vm3, %v2552_v46, -inf }
 0x530   : > { %v1538_v4 = vsel %vm761_vm3, %v1529_v47, -inf }
 0x548   : > { %v767_v48 = vpop.xlane.xlu0 %766 }
 0x549   : > { %v769_v49 = vsub.f32 %v2504_v38, %v767_v48  ;;  %v764_v50 = vpop.xlane.xlu1 %763 }
 0x54a   : > { %v768_v51 = vsub.f32 %v752_v39, %v764_v50 }
 0x54b   : > { %v772_v52 = vmul.f32 1.442695, %v769_v49 }
 0x54c   : > { %v770_v53 = vmul.f32 1.442695, %v768_v51 }
 0x54d   : > { %v2801_v54 = vpop.permute.xlu1 %2800 }
 0x54e   : > { %2828 = vpow2.f32 %v770_v53  ;;  %v2803_v55 = vunpack.i.h.bf16 %v2801_v54  ;;  %v2802_v56 = vunpack.i.l.bf16 %v2801_v54 }
 0x54f   : > { %2830 = vpow2.f32 %v772_v52 }
 0x550   : > { %v2608_v57 = vpack.c.bf16 %v2803_v55, %v2802_v56 }
 0x551   : > { %v2806_v58 = vpop.permute.xlu1 %2805 }
 0x552   : > { %v2808_v59 = vunpack.i.h.bf16 %v2806_v58  ;;  %v2807_v60 = vunpack.i.l.bf16 %v2806_v58  ;;  %2609 = vmatprep.subr.bf16.mxu0 %v2608_v57 }
 0x553   : > { %2611 = vmatpush3.bf16.msra.mxu0 %v2608_v57 }
 0x554   : > { %v2628_v61 = vpack.c.bf16 %v2808_v59, %v2807_v60  ;;  %2512 = vmatprep.subr.mxu0 %v891_v33 }
 0x555   : > { %v1836_v6 = vpop.permute.xlu1 %1835 }
 0x556   : > { %2629 = vmatprep.subr.bf16.mxu1 %v2628_v61 }
 0x557   : > { %2631 = vmatpush3.bf16.msra.mxu1 %v2628_v61 }
 0x558   : > { %v2829_v62 = vpop.eup %2828 }
 0x559   : > { %v774_v63 = vsel %vm761_vm3, %v2829_v62, 0.0  ;;  %v2831_v2 = vpop.eup %2830  ;;  %v1838_v7 = vpop.permute.xlu1 %1837 }
 0x55a   : > { %775 = vadd.xlane.f32.xlu0 %v774_v63  ;;  %v777_v3 = vsel %vm761_vm3, %v2831_v2, 0.0 }
 0x55e   : > { %778 = vadd.xlane.f32.xlu0 %v777_v3 }
 0x562   : > { %1539 = vmax.xlane.f32.xlu0 %v1538_v4 }
 0x566   : > { %1542 = vmax.xlane.f32.xlu0 %v1541_v5 }
 0x5b6   : > { %v1152_v8 = vpop.xlane.xlu1 %1151 }
 0x5b7   : > { %v1156_v9 = vsub.f32 %v1141_v44, %v1152_v8 }
 0x5b9   : > { %v1158_v10 = vmul.f32 1.442695, %v1156_v9 }
 0x5bb   : > { %2832 = vpow2.f32 %v1158_v10 }
 0x5c5   : > { %v3611_v11 = vpop.eup %2832 }
 0x5c6   : > { %v1162_v13 = vsel %vm761_vm3, %v3611_v11, 0.0 }
 0x5c7   : > { %1163 = vadd.xlane.f32.xlu1 %v1162_v13 }
 0x5e7   : > { %v776_v14 = vpop.xlane.xlu0 %775 }
 0x5e8   : > { %2834 = vrcp.f32 %v776_v14 }
 0x5eb   : > { %v779_v15 = vpop.xlane.xlu0 %778 }
 0x5ec   : > { %2836 = vrcp.f32 %v779_v15 }
 0x5ef   : > { %v1540_v16 = vpop.xlane.xlu0 %1539 }
 0x5f0   : > { %v1544_v18 = vsub.f32 %v1529_v47, %v1540_v16 }
 0x5f2   : > { %v2835_v17 = vpop.eup %2834  ;;  %v1546_v23 = vmul.f32 1.442695, %v1544_v18 }
 0x5f3   : > { %v1543_v19 = vpop.xlane.xlu0 %1542  ;;  %v782_v20 = vmul.f32 %v2835_v17, %v2829_v62 }
 0x5f4   : > { %v1545_v21 = vsub.f32 %v2552_v46, %v1543_v19 }
 0x5f5   : > { %2509 = vmatprep.mubr.msk.f32.mxu0 %vm761_vm3, %v782_v20 }
 0x5f6   : > { %v2837_v22 = vpop.eup %2836  ;;  %v1548_v25 = vmul.f32 1.442695, %v1545_v21 }
 0x5f7   : > { %v783_v26 = vmul.f32 %v2837_v22, %v2831_v2 }
 0x5f8   : > { %2838 = vpow2.f32 %v1548_v25  ;;  %v1363_v25 = vld [vmem:[#allocation11 + $0x8] sm:$0xff] }
 0x5f9   : > { %2510 = vmatmul.mubr.msk.f32.vlgmr.msra.gmra.mrb[0].mxu0 %vm761_vm3, %v783_v26  ;;  %2840 = vpow2.f32 %v1546_v23  ;;  %v1278_v23 = vld [vmem:[#allocation10 + $0x8] sm:$0xff] }
 0x5fa   : > { %2513 = vmatpush3.msra.mxu0 %v891_v33 }
 0x5fb   : > { %2517 = vmatprep.subr.mxu0 %v975_v34 }
 0x602   : > { %v2839_v27 = vpop.eup %2838 }
 0x603   : > { %v1553_v29 = vsel %vm761_vm3, %v2839_v27, 0.0  ;;  %v2841_v30 = vpop.eup %2840 }
 0x604   : > { %1554 = vadd.xlane.f32.xlu0 %v1553_v29  ;;  %v1550_v31 = vsel %vm761_vm3, %v2841_v30, 0.0 }
 0x608   : > { %1551 = vadd.xlane.f32.xlu0 %v1550_v31 }
 0x61e   : > { %2810 = vrot.lane.b32.xlu0 %v3560_v12, %s3175_s10 }
 0x63d   : > { %1154 = vmax.xlane.f32.xlu0 %v1153_v32 }
 0x653   : > { %2815 = vrot.lane.b32.xlu0 %v3600_v42, %s3176_s21 }
 0x654   : > { %v1164_v63 = vpop.xlane.xlu1 %1163 }
 0x691   : > { %v1555_v35 = vpop.xlane.xlu0 %1554 }
 0x692   : > { %2842 = vrcp.f32 %v1555_v35 }
 0x695   : > { %v1552_v28 = vpop.xlane.xlu0 %1551 }
 0x696   : > { %2844 = vrcp.f32 %v1552_v28 }
 0x699   : > { %v2811_v36 = vpop.permute.xlu0 %2810 }
 0x69a   : > { %v2813_v37 = vunpack.i.h.bf16 %v2811_v36  ;;  %v2812_v38 = vunpack.i.l.bf16 %v2811_v36 }
 0x69c   : > { %v2632_v12 = vpack.c.bf16 %v2813_v37, %v2812_v38  ;;  %v2843_v39 = vpop.eup %2842 }
 0x69d   : > { %v1559_v44 = vmul.f32 %v2843_v39, %v2839_v27 }
 0x69e   : > { %2634 = vmatprep.subr.msk.bf16.mxu1 %vm3573_vm2, %v2632_v12 }
 0x6a0   : > { %v2845_v40 = vpop.eup %2844 }
 0x6a1   : > { %v1558_v41 = vmul.f32 %v2845_v40, %v2841_v30 }
 0x6a3   : > { %2557 = vmatprep.mubr.msk.f32.mxu1 %vm761_vm3, %v1558_v41  ;;  %v1666_v41 = vld [vmem:[#allocation10 + $0x10] sm:$0xff] }
 0x6a4   : > { %2558 = vmatmul.mubr.msk.f32.vlgmr.msra.gmra.mrb[10].mxu1 %vm761_vm3, %v1559_v44 }
 0x6a5   : > { %2637 = vmatpush3.bf16.xpose.msk.msra.mxu1 %vm3573_vm2, %v2632_v12  ;;  %2574 = vmatprep.mubr.msk.f32.mxu1 %vm675_vm1, %v1836_v6 }
 0x6ac   : > { %2575 = vmatmul.mubr.msk.f32.vlgmr.msra.gmra.mrb[12].mxu1 %vm675_vm1, %v1838_v7 }
 0x6ca   : > { %v1155_v45 = vpop.xlane.xlu0 %1154 }
 0x6cb   : > { %v1157_v46 = vsub.f32 %v3604_v43, %v1155_v45 }
 0x6cc   : > { %v2511_v47 = vpop.f32.mrb[0].mxu0 }
 0x6cd   : > { %v1160_v48 = vmul.f32 1.442695, %v1157_v46  ;;  %v874_v49 = vmul.f32 %v2511_v47, %v2511_v47  ;;  %v864_v50 = vpop.f32.mrb[1].mxu0 }
 0x6ce   : > { %v873_v51 = vmul.f32 %v864_v50, %v864_v50  ;;  %v2816_v52 = vpop.permute.xlu0 %2815  ;;  %2514 = vmatprep.mubr.msk.f32.mxu0 %vm675_vm1, %v864_v50 }
 0x6cf   : > { %2846 = vpow2.f32 %v1160_v48  ;;  %v876_v53 = vmul.f32 %v2511_v47, %v874_v49  ;;  %v2818_v54 = vunpack.i.h.bf16 %v2816_v52  ;;  %v2817_v24 = vunpack.i.l.bf16 %v2816_v52  ;;  %2515 = vmatmul.mubr.msk.f32.vlgmr.msra.gmra.mrb[2].mxu0 %vm675_vm1, %v2511_v47 }
 0x6d0   : > { %v875_v55 = vmul.f32 %v873_v51, %v864_v50  ;;  %2518 = vmatpush3.msra.mxu0 %v975_v34 }
 0x6d1   : > { %v878_v56 = vmul.f32 0.044715, %v876_v53  ;;  %v2618_v57 = vpack.c.bf16 %v2818_v54, %v2817_v24 }
 0x6d2   : > { %v877_v58 = vmul.f32 0.044715, %v875_v55 }
 0x6d3   : > { %v880_v43 = vadd.f32 %v2511_v47, %v878_v56  ;;  %2619 = vmatprep.subr.bf16.mxu0 %v2618_v57 }
 0x6d4   : > { %v879_v59 = vadd.f32 %v877_v58, %v864_v50 }
 0x6d5   : > { %v882_v60 = vmul.f32 0.7978846, %v880_v43 }
 0x6d6   : > { %v881_v61 = vmul.f32 0.7978846, %v879_v59 }
 0x6d7   : > { %2848 = vtanh.f32 %v882_v60 }
 0x6d8   : > { %2850 = vtanh.f32 %v881_v61 }
 0x6d9   : > { %v2847_v62 = vpop.eup %2846  ;;  %2852 = vrcp.f32 %v1164_v63 }
 0x6da   : > { %v1165_v2 = vsel %vm761_vm3, %v2847_v62, 0.0 }
 0x6db   : > { %1166 = vadd.xlane.f32.xlu1 %v1165_v2 }
 0x6e1   : > { %v2849_v3 = vpop.eup %2848 }
 0x6e2   : > { %v2851_v4 = vpop.eup %2850  ;;  %v886_v5 = vadd.f32 1.0, %v2849_v3 }
 0x6e3   : > { %v885_v6 = vadd.f32 1.0, %v2851_v4  ;;  %v2853_v9 = vpop.eup %2852 }
 0x6e4   : > { %v888_v7 = vmul.f32 0.5, %v886_v5  ;;  %v1170_v14 = vmul.f32 %v2853_v9, %v3611_v11  ;;  %v1751_v5 = vld [vmem:[#allocation11 + $0x10] sm:$0xff] }
 0x6e5   : > { %v887_v8 = vmul.f32 0.5, %v885_v6 }
 0x6e6   : > { %v890_v13 = vmul.f32 %v2511_v47, %v888_v7 }
 0x6e7   : > { %v889_v10 = vmul.f32 %v887_v8, %v864_v50 }
 0x6e9   : > { %2519 = vmatprep.mubr.msk.f32.mxu0 %vm675_vm1, %v889_v10 }
 0x6ea   : > { %2520 = vmatmul.mubr.msk.f32.vlgmr.msra.gmra.mrb[2].mxu0 %vm675_vm1, %v890_v13 }
 0x6eb   : > { %2621 = vmatpush3.bf16.msra.mxu0 %v2618_v57  ;;  %2533 = vmatprep.mubr.msk.f32.mxu0 %vm761_vm3, %v1170_v14 }
 0x6ec   : > { %2536 = vmatprep.subr.mxu0 %v1278_v23 }
 0x768   : > { %v1167_v15 = vpop.xlane.xlu1 %1166 }
 0x769   : > { %2854 = vrcp.f32 %v1167_v15 }
 0x773   : > { %v2855_v16 = vpop.eup %2854 }
 0x774   : > { %v1171_v17 = vmul.f32 %v2855_v16, %v2847_v62 }
 0x776   : > { %2534 = vmatmul.mubr.msk.f32.vlgmr.msra.gmra.mrb[4].mxu0 %vm761_vm3, %v1171_v17 }
 0x777   : > { %v3640_v18 = vpop.f32.mrb[10].mxu1  ;;  %2537 = vmatpush3.msra.mxu0 %v1278_v23 }
 0x778   : > { %v3642_v19 = vpop.f32.mrb[11].mxu1  ;;  %2541 = vmatprep.subr.mxu0 %v1363_v25  ;;  %v1648_v44 = vmul.f32 %v3640_v18, %v3640_v18 }
 0x779   : > { %v1647_v36 = vmul.f32 %v3642_v19, %v3642_v19 }
 0x77a   : > { %v1650_v49 = vmul.f32 %v3640_v18, %v1648_v44 }
 0x77b   : > { %v1649_v37 = vmul.f32 %v1647_v36, %v3642_v19 }
 0x77c   : > { %v1652_v24 = vmul.f32 0.044715, %v1650_v49 }
 0x77d   : > { %v1651_v46 = vmul.f32 0.044715, %v1649_v37 }
 0x77e   : > { %v1654_v56 = vadd.f32 %v3640_v18, %v1652_v24 }
 0x77f   : > { %v2576_v20 = vpop.f32.mrb[12].mxu1  ;;  %v1653_v51 = vadd.f32 %v1651_v46, %v3642_v19 }
 0x780   : > { %v1917_v21 = vpop.f32.mrb[13].mxu1  ;;  %v1929_v11 = vsel %vm761_vm3, %v2576_v20, -inf  ;;  %v1656_v57 = vmul.f32 0.7978846, %v1654_v56 }
 0x781   : > { %v1926_v22 = vsel %vm761_vm3, %v1917_v21, -inf  ;;  %v1655_v55 = vmul.f32 0.7978846, %v1653_v51 }
 0x782   : > { %1927 = vmax.xlane.f32.xlu1 %v1926_v22 }
 0x786   : > { %1930 = vmax.xlane.f32.xlu1 %v1929_v11 }
 0x80f   : > { %v1928_v26 = vpop.xlane.xlu1 %1927 }
 0x810   : > { %v1932_v27 = vsub.f32 %v1917_v21, %v1928_v26 }
 0x812   : > { %v1934_v31 = vmul.f32 1.442695, %v1932_v27 }
 0x813   : > { %v1931_v29 = vpop.xlane.xlu1 %1930 }
 0x814   : > { %v1933_v30 = vsub.f32 %v2576_v20, %v1931_v29 }
 0x816   : > { %v1936_v32 = vmul.f32 1.442695, %v1933_v30 }
 0x818   : > { %2856 = vpow2.f32 %v1936_v32 }
 0x819   : > { %2858 = vpow2.f32 %v1934_v31 }
 0x822   : > { %v3646_v33 = vpop.eup %2856 }
 0x823   : > { %v1941_v34 = vsel %vm761_vm3, %v3646_v33, 0.0  ;;  %v3650_v35 = vpop.eup %2858 }
 0x824   : > { %1942 = vadd.xlane.f32.xlu1 %v1941_v34  ;;  %v1938_v28 = vsel %vm761_vm3, %v3650_v35, 0.0 }
 0x828   : > { %1939 = vadd.xlane.f32.xlu1 %v1938_v28 }
 0x839   : > { %2820 = vrot.lane.b32.xlu1 %v3600_v42, %s3177_s24 }
 0x849   : > { %v2535_v38 = vpop.f32.mrb[4].mxu0 }
 0x84a   : > { %v1260_v12 = vmul.f32 %v2535_v38, %v2535_v38  ;;  %v1250_v39 = vpop.f32.mrb[5].mxu0 }
 0x84b   : > { %v1259_v40 = vmul.f32 %v1250_v39, %v1250_v39  ;;  %2538 = vmatprep.mubr.msk.f32.mxu0 %vm675_vm1, %v1250_v39 }
 0x84c   : > { %v1262_v45 = vmul.f32 %v2535_v38, %v1260_v12  ;;  %2539 = vmatmul.mubr.msk.f32.vlgmr.msra.gmra.mrb[2].mxu0 %vm675_vm1, %v2535_v38 }
 0x84d   : > { %v1261_v42 = vmul.f32 %v1259_v40, %v1250_v39  ;;  %2542 = vmatpush3.msra.mxu0 %v1363_v25  ;;  %v2139_v25 = vld [vmem:[#allocation11 + $0x18] sm:$0xff] }
 0x84e   : > { %v1264_v47 = vmul.f32 0.044715, %v1262_v45  ;;  %2560 = vmatprep.subr.mxu0 %v1666_v41 }
 0x84f   : > { %v1263_v48 = vmul.f32 0.044715, %v1261_v42  ;;  %v2394_v42 = vld [vmem:[#allocation13] ss:$0 sm:$0xff] }
 0x850   : > { %v1266_v50 = vadd.f32 %v2535_v38, %v1264_v47  ;;  %v668_v47 = vadd.f32 %v2394_v42, %v3513_v1 }
 0x851   : > { %v1265_v52 = vadd.f32 %v1263_v48, %v1250_v39  ;;  %v667_v48 = vadd.f32 %v2394_v42, %v3511_v0 }
 0x852   : > { %v1268_v53 = vmul.f32 0.7978846, %v1266_v50 }
 0x853   : > { %v1267_v54 = vmul.f32 0.7978846, %v1265_v52 }
 0x854   : > { %2860 = vtanh.f32 %v1268_v53 }
 0x855   : > { %2862 = vtanh.f32 %v1267_v54 }
 0x856   : > { %2864 = vtanh.f32 %v1655_v55 }
 0x857   : > { %2866 = vtanh.f32 %v1656_v57 }
 0x85e   : > { %v2861_v58 = vpop.eup %2860 }
 0x85f   : > { %v2863_v43 = vpop.eup %2862  ;;  %v1272_v59 = vadd.f32 1.0, %v2861_v58 }
 0x860   : > { %v1271_v60 = vadd.f32 1.0, %v2863_v43  ;;  %v2865_v63 = vpop.eup %2864 }
 0x861   : > { %v1274_v61 = vmul.f32 0.5, %v1272_v59  ;;  %v1659_v4 = vadd.f32 1.0, %v2865_v63  ;;  %v2867_v6 = vpop.eup %2866 }
 0x862   : > { %v1273_v62 = vmul.f32 0.5, %v1271_v60  ;;  %v1660_v8 = vadd.f32 1.0, %v2867_v6 }
 0x863   : > { %v1276_v3 = vmul.f32 %v2535_v38, %v1274_v61  ;;  %v1661_v7 = vmul.f32 0.5, %v1659_v4 }
 0x864   : > { %v1275_v2 = vmul.f32 %v1273_v62, %v1250_v39  ;;  %v1662_v10 = vmul.f32 0.5, %v1660_v8 }
 0x865   : > { %v1663_v9 = vmul.f32 %v1661_v7, %v3642_v19 }
 0x866   : > { %2543 = vmatprep.mubr.msk.f32.mxu0 %vm675_vm1, %v1275_v2  ;;  %v1664_v13 = vmul.f32 %v3640_v18, %v1662_v10 }
 0x867   : > { %2544 = vmatmul.mubr.msk.f32.vlgmr.msra.gmra.mrb[2].mxu0 %vm675_vm1, %v1276_v3 }
 0x868   : > { %2562 = vmatprep.mubr.msk.f32.mxu0 %vm675_vm1, %v3642_v19  ;;  %2561 = vmatpush3.msra.mxu0 %v1666_v41 }
 0x869   : > { %2565 = vmatprep.subr.mxu0 %v1751_v5 }
 0x86f   : > { %2563 = vmatmul.mubr.msk.f32.vlgmr.msra.gmra.mrb[2].mxu0 %vm675_vm1, %v3640_v18  ;;  %v2054_v18 = vld [vmem:[#allocation10 + $0x18] sm:$0xff] }
 0x870   : > { %2567 = vmatprep.mubr.msk.f32.mxu0 %vm675_vm1, %v1663_v9  ;;  %2566 = vmatpush3.msra.mxu0 %v1751_v5 }
 0x877   : > { %2568 = vmatmul.mubr.msk.f32.vlgmr.msra.gmra.mrb[2].mxu0 %vm675_vm1, %v1664_v13 }
 0x8b1   : > { %v1943_v14 = vpop.xlane.xlu1 %1942 }
 0x8b2   : > { %2868 = vrcp.f32 %v1943_v14 }
 0x8b5   : > { %v1940_v15 = vpop.xlane.xlu1 %1939 }
 0x8b6   : > { %2870 = vrcp.f32 %v1940_v15 }
 0x8b9   : > { %v2821_v16 = vpop.permute.xlu1 %2820 }
 0x8ba   : > { %v2823_v17 = vunpack.i.h.bf16 %v2821_v16  ;;  %v2822_v20 = vunpack.i.l.bf16 %v2821_v16 }
 0x8bc   : > { %v2638_v21 = vpack.c.bf16 %v2823_v17, %v2822_v20  ;;  %v2869_v19 = vpop.eup %2868 }
 0x8bd   : > { %v1947_v23 = vmul.f32 %v2869_v19, %v3646_v33 }
 0x8be   : > { %2639 = vmatprep.subr.bf16.mxu0 %v2638_v21 }
 0x8bf   : > { %2641 = vmatpush3.bf16.msra.mxu0 %v2638_v21 }
 0x8c0   : > { %v2871_v22 = vpop.eup %2870  ;;  %2584 = vmatprep.subr.mxu0 %v2054_v18 }
 0x8c1   : > { %v1946_v11 = vmul.f32 %v2871_v22, %v3650_v35 }
 0x8c3   : > { %2581 = vmatprep.mubr.msk.f32.mxu0 %vm761_vm3, %v1946_v11 }
 0x8c4   : > { %2582 = vmatmul.mubr.msk.f32.vlgmr.msra.gmra.mrb[6].mxu0 %vm761_vm3, %v1947_v23 }
 0x8c5   : > { %2585 = vmatpush3.msra.mxu0 %v2054_v18 }
 0x8c6   : > { %2589 = vmatprep.subr.mxu0 %v2139_v25 }
 0x997   : > { %v2583_v26 = vpop.f32.mrb[6].mxu0 }
 0x998   : > { %v2036_v27 = vmul.f32 %v2583_v26, %v2583_v26  ;;  %v2026_v29 = vpop.f32.mrb[7].mxu0 }
 0x999   : > { %v2035_v30 = vmul.f32 %v2026_v29, %v2026_v29  ;;  %2586 = vmatprep.mubr.msk.f32.mxu0 %vm675_vm1, %v2026_v29 }
 0x99a   : > { %v2038_v31 = vmul.f32 %v2583_v26, %v2036_v27  ;;  %2587 = vmatmul.mubr.msk.f32.vlgmr.msra.gmra.mrb[2].mxu0 %vm675_vm1, %v2583_v26 }
 0x99b   : > { %v2037_v32 = vmul.f32 %v2035_v30, %v2026_v29  ;;  %2590 = vmatpush3.msra.mxu0 %v2139_v25 }
 0x99c   : > { %v2040_v33 = vmul.f32 0.044715, %v2038_v31 }
 0x99d   : > { %v2039_v34 = vmul.f32 0.044715, %v2037_v32 }
 0x99e   : > { %v2042_v35 = vadd.f32 %v2583_v26, %v2040_v33 }
 0x99f   : > { %v2041_v28 = vadd.f32 %v2039_v34, %v2026_v29 }
 0x9a0   : > { %v2044_v36 = vmul.f32 0.7978846, %v2042_v35 }
 0x9a1   : > { %v2043_v37 = vmul.f32 0.7978846, %v2041_v28 }
 0x9a2   : > { %2872 = vtanh.f32 %v2044_v36 }
 0x9a3   : > { %2874 = vtanh.f32 %v2043_v37 }
 0x9ac   : > { %v2873_v38 = vpop.eup %2872 }
 0x9ad   : > { %v2875_v12 = vpop.eup %2874  ;;  %v2048_v39 = vadd.f32 1.0, %v2873_v38 }
 0x9ae   : > { %v2047_v40 = vadd.f32 1.0, %v2875_v12 }
 0x9af   : > { %v2050_v41 = vmul.f32 0.5, %v2048_v39 }
 0x9b0   : > { %v2049_v44 = vmul.f32 0.5, %v2047_v40 }
 0x9b1   : > { %v2052_v46 = vmul.f32 %v2583_v26, %v2050_v41 }
 0x9b2   : > { %v2051_v45 = vmul.f32 %v2049_v44, %v2026_v29 }
 0x9b4   : > { %2591 = vmatprep.mubr.msk.f32.mxu0 %vm675_vm1, %v2051_v45 }
 0x9b5   : > { %2592 = vmatmul.mubr.msk.f32.vlgmr.msra.gmra.mrb[2].mxu0 %vm675_vm1, %v2052_v46 }
 0xa88   : > { %v2593_v49 = vpop.f32.mrb[2].mxu0 }
 0xa89   : > { %v2642_v50 = vadd.f32 %v2593_v49, %v668_v47  ;;  %v2212_v51 = vpop.f32.mrb[3].mxu0 }
 0xa8a   : > { %v2643_v1 = vadd.f32 %v2212_v51, %v667_v48 }
 0xa8b   : > { %2224 = vst.msk [vmem:[%s458_s18 + $0x8] sm:$0xff] %vm463_vm0, %v2642_v50 }
 0xa8c   : > { %2223 = vst.msk [vmem:[%s458_s18] sm:$0xff] %vm463_vm0, %v2643_v1 }
 0xa8d   : > { %3087 = shalt.err (!%p3084_p8)
}
 0xa8e   : > { %s3088_s10 = scalar_lea.hbm %s3693_s3, 256  ;;  %s3092_s18 = scalar_lea.hbm %s3779_s26, 512 }
 0xa8f   : > { %p3089_p13 = scmp.ne.s32.totalorder %s3693_s3, %s3088_s10  ;;  %p3093_p9 = scmp.lt.u32.totalorder %s3693_s3, %s3779_s26 }
 0xa90   : > { %p3094_p10 = scmp.lt.u32.totalorder %s3092_s18, %s3088_s10  ;;  %p3096_p6 = scmp.lt.u32.totalorder %s3088_s10, %s3693_s3 }
 0xa91   : > { %p3090_p0 = pnand %p3089_p13, %p3780_p12 }
 0xa92   : > { %p3095_p11 = por %p3094_p10, %p3093_p9 }
 0xa93   : > { %p3091_p2 = pneg %p3090_p0 }
 0xa94   : > { %p3097_p5 = por %p3096_p6, %p3095_p11 }
 0xa96   : > { %p3098_p7 = pnand %p3097_p5, %p3091_p2 }
 0xa98   : > { %3101 = shalt.err (!%p3098_p7)
}
 0xa99   : > { %s3179_s22 = smov 128   ;;  %s3180_s19 = smov 8  }
 0xa9a   : > { %2684 = dma.vmem_to_hbm [thread:$0]  (%p3780_p12), %s3688_s30, 256, %s3693_s3, %s2226_s4, %s3179_s22, %s3179_s22, %s3180_s19  }
 0xa9b PF: > { %s2254_s28 = sand.u32 1, %s3140_s13   ;;  %p3781_p4 = scmp.ne.s32.totalorder %s3767_s12, 0 }
 0xa9c   : > { %p3782_p1 = scmp.ge.s32.totalorder %s3152_s16, 2  ;;  %s2255_s11 = scalar_lea.sflag [#allocation4], %s2254_s28 }
 0xa9e   : > { %p2710_p3 = pnand %p3782_p1, %p3781_p4 }
 0xaa0   : > { %3135 = dma.done.wait (!%p2710_p3), %s2255_s11, 256  }
 0xaa1   : > { %3137 = vsyncadd (!%p2710_p3), %s2255_s11, 4294967040  ;;  %p26_p8 = scmp.ge.s32.totalorder %s3407_s23, 4   ;;  %s3783_s13 = smov %s3144_s14 }
 0xaa2   : > { %s3784_s14 = smov %s3148_s15  ;;  %s3785_s15 = smov %s3418_s27 }
 0xaa3   : > { %s3786_s16 = smov %s3407_s23  ;;  %28 = sbr.rel (!%p26_p8) target bundleno = 13 (0xd), region = 135 }
 0xaaa   :  { %2260 = vsyncpa [#allocation3], 1 }
 0xaab   :  { %2262 = vsyncpa [#allocation3 + $0x1], 1 }
 0xaac   :  { %2263 = vsyncpa [#allocation6], 1 }
 0xaad   :  { %2264 = vsyncpa [#allocation9], 1 }
 0xaae   :  { %2265 = vsyncpa [#allocation12], 1 }
 0xaaf   :  { %2266 = vsyncpa [#allocation4], 1 }
 0xab0   :  { %2268 = vsyncpa [#allocation4 + $0x1], 1 }

</bundles_post_ra>
